<compile_context>
chip_gen: v5e
topology: v5e:2x2
jax: 0.10.0
libtpu: 0.0.40
codegen_flags: <defaults>
</compile_context>

<pallas_src>
import jax
import jax.numpy as jnp
from jax.experimental import pallas as pl
from jax.experimental.pallas import tpu as pltpu


_TM_MAX = 256      # 256-aligned M tiles suit the 2x256x256 MXU at large batch
_TN_MAX = 1024
_TK_MAX = 2048


def _round_up(x, m):
    return (x + m - 1) // m * m


def _largest_tile(total, cap, unit=128):
    """Largest multiple of `unit` that divides `total` and is <= cap."""
    best = unit
    t = unit
    stop = min(cap, total)
    while t <= stop:
        if total % t == 0:
            best = t
        t += unit
    return best


def _linear_kernel_single_k(x_ref, wt_ref, b_ref, o_ref):
    """Whole K fits one tile: one dot + bias + lane-dense store."""
    x = x_ref[...].astype(wt_ref.dtype)           # in-kernel bf16 cast (VPU)
    acc = jnp.dot(x, wt_ref[...], preferred_element_type=jnp.float32)
    o_ref[...] = (acc + b_ref[...]).astype(o_ref.dtype)


def _linear_kernel_multi_k(x_ref, wt_ref, b_ref, o_ref):
    """K tiled: accumulate directly into the resident f32 output tile."""
    k = pl.program_id(2)

    @pl.when(k == 0)
    def _init():
        # Fold the bias add into the accumulator init.
        o_ref[...] = jnp.broadcast_to(b_ref[...], o_ref.shape)

    x = x_ref[...].astype(wt_ref.dtype)           # in-kernel bf16 cast (VPU)
    o_ref[...] += jnp.dot(x, wt_ref[...], preferred_element_type=jnp.float32)


def prepare_linear_classifier_params(
    weight, bias, *, compute_dtype=jnp.bfloat16, tk_max=_TK_MAX
):
    """One-time parameter layout (call once, outside the per-step path).

    Args:
      weight: (num_labels, dim) float32   -- nn.Linear convention
      bias:   (num_labels,)     float32
    Returns:
      wt_p: (D_pad, N_pad) compute_dtype  -- W.T, zero-padded
      b_p:  (1, N_pad)     float32        -- bias, zero-padded
    """
    N, D = weight.shape
    D128 = _round_up(D, 128)
    D_pad = D128 if D128 <= tk_max else _round_up(D, tk_max)
    N_pad = _round_up(N, 128)
    wt_p = jnp.pad(weight.T, ((0, D_pad - D), (0, N_pad - N))).astype(compute_dtype)
    b_p = jnp.pad(bias, (0, N_pad - N)).reshape(1, N_pad).astype(jnp.float32)
    return wt_p, b_p


def linear_classifier_forward(
    x, wt_p, b_p, num_labels, *, tm_max=_TM_MAX, tn_max=_TN_MAX, tk_max=_TK_MAX
):
    """Pallas implementation of LinearClassifier.forward.

    Args:
      x:          (B, *feature_dims) float32
      wt_p, b_p:  outputs of prepare_linear_classifier_params
      num_labels: original number of labels (for slicing off lane padding)
    Returns:
      (B, num_labels) float32
    """
    B = x.shape[0]
    x2d = x.reshape(B, -1)                        # x.view(x.size(0), -1)
    D = x2d.shape[1]
    D_pad, N_pad = wt_p.shape
    assert D <= D_pad, (D, D_pad)
    assert num_labels <= N_pad, (num_labels, N_pad)

    # ---- tile selection --------------------------------------------------
    tm = min(tm_max, _round_up(B, 8))             # f32 x/out sublane multiple
    tk = D_pad if D_pad <= tk_max else tk_max     # collapse K axis if it fits
    assert D_pad % tk == 0
    tn = _largest_tile(N_pad, tn_max)

    B_pad = _round_up(B, tm)
    m_blocks = B_pad // tm
    # v7x has 2 TensorCores: keep >= 2 blocks on a "parallel" axis if possible.
    if m_blocks == 1 and N_pad // tn == 1 and N_pad > 128:
        tn = _largest_tile(N_pad, N_pad // 2)
    n_blocks = N_pad // tn
    k_blocks = D_pad // tk

    # ---- activation padding (stays f32; cast to bf16 inside the kernel) ---
    x_p = jnp.pad(x2d, ((0, B_pad - B), (0, D_pad - D)))

    out_dtype = jnp.float32   # f32 output => safe to accumulate into o_ref

    cost = pl.CostEstimate(
        flops=2 * B_pad * D_pad * N_pad,
        transcendentals=0,
        bytes_accessed=(
            x_p.size * x_p.dtype.itemsize
            + m_blocks * wt_p.size * wt_p.dtype.itemsize   # W re-streamed per M tile
            + b_p.size * b_p.dtype.itemsize
            + B_pad * N_pad * jnp.dtype(out_dtype).itemsize
        ),
    )

    # Double-buffered x / W / out tiles + bias; clamp limit to stay v7x-safe.
    tile_bytes = 2 * (tm * tk * 4 + tk * tn * 2 + tm * tn * 4) + tn * 4
    vmem_limit = int(min(max(2 * tile_bytes, 32 << 20), 48 << 20))

    if k_blocks == 1:
        grid = (m_blocks, n_blocks)
        kernel = _linear_kernel_single_k
        in_specs = [
            pl.BlockSpec((tm, tk), lambda i, j: (i, 0)),   # x tile
            pl.BlockSpec((tk, tn), lambda i, j: (0, j)),   # W.T tile
            pl.BlockSpec((1, tn), lambda i, j: (0, j)),    # bias tile
        ]
        out_specs = pl.BlockSpec((tm, tn), lambda i, j: (i, j))
        dims = ("parallel", "parallel")
    else:
        grid = (m_blocks, n_blocks, k_blocks)
        kernel = _linear_kernel_multi_k
        in_specs = [
            pl.BlockSpec((tm, tk), lambda i, j, k: (i, k)),   # x tile
            pl.BlockSpec((tk, tn), lambda i, j, k: (k, j)),   # W.T tile
            pl.BlockSpec((1, tn), lambda i, j, k: (0, j)),    # bias tile
        ]
        out_specs = pl.BlockSpec((tm, tn), lambda i, j, k: (i, j))
        dims = ("parallel", "parallel", "arbitrary")

    out_p = pl.pallas_call(
        kernel,
        out_shape=jax.ShapeDtypeStruct((B_pad, N_pad), out_dtype),
        grid_spec=pltpu.PrefetchScalarGridSpec(
            num_scalar_prefetch=0,
            grid=grid,
            in_specs=in_specs,
            out_specs=out_specs,
        ),
        compiler_params=pltpu.CompilerParams(
            dimension_semantics=dims,
            vmem_limit_bytes=vmem_limit,
        ),
        cost_estimate=cost,
    )(x_p, wt_p, b_p)

    return out_p[:B, :num_labels]


if __name__ == "__main__":
    key = jax.random.PRNGKey(0)
    kx, kw = jax.random.split(key)

    # Features flatten to dim = 4*16*16 = 1024; module-default 1000 labels
    # (exercises the 1000 -> 1024 lane padding and the N-tile split).
    B, C, H, W = 2, 4, 16, 16
    dim = C * H * W
    num_labels = 1000

    x = jax.random.normal(kx, (B, C, H, W), dtype=jnp.float32)

    # Deterministic parameter init mirroring the module's __init__:
    #   weight ~ Normal(0, 0.01), bias = 0
    weight = 0.01 * jax.random.normal(kw, (num_labels, dim), dtype=jnp.float32)
    bias = jnp.zeros((num_labels,), dtype=jnp.float32)

    # One-time parameter layout (outside the per-call path).
    wt_p, b_p = prepare_linear_classifier_params(weight, bias)

    out = linear_classifier_forward(x, wt_p, b_p, num_labels)
    out = jax.block_until_ready(out)
    assert out.shape == (B, num_labels)

    # Reference 1: full-f32 reference (loose tolerance: kernel computes in bf16).
    ref_f32 = (
        jnp.dot(x.reshape(B, -1), weight.T, precision=jax.lax.Precision.HIGHEST)
        + bias
    )
    assert jnp.allclose(out, ref_f32, atol=3e-2, rtol=3e-2), float(
        jnp.max(jnp.abs(out - ref_f32))
    )

    # Reference 2: bf16-quantized-input reference (tight tolerance).
    xq = x.reshape(B, -1).astype(jnp.bfloat16).astype(jnp.float32)
    wq = weight.T.astype(jnp.bfloat16).astype(jnp.float32)
    ref_bf16 = jnp.dot(xq, wq, precision=jax.lax.Precision.HIGHEST) + bias
    assert jnp.allclose(out, ref_bf16, atol=1e-3, rtol=1e-3), float(
        jnp.max(jnp.abs(out - ref_bf16))
    )

    print("KERNEL_OK")
</pallas_src>

<mosaic_0001>
module attributes {stable_mosaic.version = 11 : i64} {
  func.func @_linear_kernel_single_k(%arg0: i32, %arg1: i32, %arg2: memref<8x1024xf32, #tpu.memory_space<vmem>>, %arg3: memref<1024x512xbf16, #tpu.memory_space<vmem>>, %arg4: memref<1x512xf32, #tpu.memory_space<vmem>>, %arg5: memref<8x512xf32, #tpu.memory_space<vmem>>) attributes {dimension_semantics = [#tpu.dimension_semantics<parallel>, #tpu.dimension_semantics<parallel>], iteration_bounds = array<i64: 1, 2>, scalar_prefetch = 0 : i64, scratch_operands = 0 : i64, tpu.core_type = #tpu.core_type<tc>, window_params = [{transform_indices = @transform_0, window_bounds = array<i64: 8, 1024>}, {transform_indices = @transform_1, window_bounds = array<i64: 1024, 512>}, {transform_indices = @transform_2, window_bounds = array<i64: 1, 512>}, {transform_indices = @transform_3, window_bounds = array<i64: 8, 512>}]} {
    %c0 = arith.constant 0 : index
    %c0_0 = arith.constant 0 : index
    %0 = vector.load %arg2[%c0, %c0_0] : memref<8x1024xf32, #tpu.memory_space<vmem>>, vector<8x1024xf32>
    %1 = arith.truncf %0 : vector<8x1024xf32> to vector<8x1024xbf16>
    %c0_1 = arith.constant 0 : index
    %c0_2 = arith.constant 0 : index
    %2 = vector.load %arg3[%c0_1, %c0_2] : memref<1024x512xbf16, #tpu.memory_space<vmem>>, vector<1024x512xbf16>
    %cst = arith.constant dense<0.000000e+00> : vector<8x512xf32>
    %3 = tpu.matmul %1, %2, %cst {dimension_numbers = #tpu.dot_dimension_numbers<[1], [0], [0], [1], [0, 0, 1, 1], [], []>} : vector<8x1024xbf16>, vector<1024x512xbf16>, vector<8x512xf32> -> vector<8x512xf32>
    %c0_3 = arith.constant 0 : index
    %c0_4 = arith.constant 0 : index
    %4 = vector.load %arg4[%c0_3, %c0_4] : memref<1x512xf32, #tpu.memory_space<vmem>>, vector<1x512xf32>
    %5 = vector.broadcast %4 : vector<1x512xf32> to vector<8x512xf32>
    %6 = arith.addf %3, %5 : vector<8x512xf32>
    %c0_5 = arith.constant 0 : index
    %c0_6 = arith.constant 0 : index
    %7 = vector.load %arg5[%c0_5, %c0_6] : memref<8x512xf32, #tpu.memory_space<vmem>>, vector<8x512xf32>
    tpu.vector_store %arg5[%c0_5, %c0_6], %6 {strides = array<i32>} : memref<8x512xf32, #tpu.memory_space<vmem>>, vector<8x512xf32>,
    return
  }
  func.func @transform_0(%arg0: i32, %arg1: i32) -> (i32, i32) {
    %c0_i32 = arith.constant 0 : i32
    %c0_i32_0 = arith.constant 0 : i32
    return %arg0, %c0_i32 : i32, i32
  }
  func.func @transform_1(%arg0: i32, %arg1: i32) -> (i32, i32) {
    %c0_i32 = arith.constant 0 : i32
    %c0_i32_0 = arith.constant 0 : i32
    return %c0_i32, %arg1 : i32, i32
  }
  func.func @transform_2(%arg0: i32, %arg1: i32) -> (i32, i32) {
    %c0_i32 = arith.constant 0 : i32
    %c0_i32_0 = arith.constant 0 : i32
    return %c0_i32, %arg1 : i32, i32
  }
  func.func @transform_3(%arg0: i32, %arg1: i32) -> (i32, i32) {
    %c0_i32 = arith.constant 0 : i32
    return %arg0, %arg1 : i32, i32
  }
}

</mosaic_0001>

<bundles_post_ra>
// kernel: tpu_custom_call.1
= control target key start
LH: loop header
LB: loop body
LE: loop exit
PB: predicated region body
PF: predicated region fallthrough
CT: control target
= control target key end

     0   :  { %8 = vsyncpa [#allocation3], 0  ;;  %s4733_s0 = inlined_call_operand.hbm [shape: f32[8,1024], index: 0, kind: input, shape index: {}]   ;;  %s4734_s1 = inlined_call_operand.hbm [shape: bf16[1024,1024], index: 1, kind: input, shape index: {}]   ;;  %s4735_s2 = inlined_call_operand.hbm [shape: f32[1,1024], index: 2, kind: input, shape index: {}]   ;;  %s4736_s3 = inlined_call_operand.hbm [shape: f32[8,1024], index: 3, kind: output, shape index: {}]  }
   0x1   :  { %9 = vsyncpa [#allocation6], 0 }
   0x2   :  { %11 = vsyncpa [#allocation6 + $0x1], 0 }
   0x3   :  { %12 = vsyncpa [#allocation4], 0 }
   0x4   :  { %14 = vsyncpa [#allocation4 + $0x1], 0  ;;  %s3968_s12 = smov 0   ;;  %s3970_s13 = smov 0  }
   0x5   :  { %s3972_s14 = smov 0   ;;  %s3974_s15 = smov 0  }
   0x6   :  { %s3976_s16 = smov 0   ;;  %s3978_s17 = smov 0  }
   0x7 LB: > { %s29_s18 = sadd.s32 1, %s3938_s16  ;;  %s65_s19 = sadd.s32 1, %s3930_s14  ;;  %s3942_s17 = sphi %s3978_s17, %s20_s17   ;;  %s3938_s16 = sphi %s3976_s16, %s4747_s16   ;;  %s3934_s15 = sphi %s3974_s15, %s4746_s15   ;;  %s3930_s14 = sphi %s3972_s14, %s4745_s14   ;;  %s3926_s13 = sphi %s3970_s13, %s4744_s13   ;;  %s3922_s12 = sphi %s3968_s12, %s4743_s12  }
   0x8   : > { %p30_p0 = scmp.ge.s32.totalorder %s29_s18, 2  ;;  %p72_p1 = scmp.ne.s32.totalorder %s3930_s14, %s3926_s13 }
   0x9   : > { %p73_p2 = scmp.eq.s32.totalorder %s3942_s17, 0  ;;  %p2387_p3 = scmp.ge.s32.totalorder %s3942_s17, 2 }
   0xa   : > { %s4749_s18 = smov (%p30_p0, %s29_s18), 0  ;;  %p3711_p5 = scmp.lt.s32.totalorder %s3942_s17, 2 }
   0xb   : > { %p4009_p4 = por %p73_p2, %p72_p1  ;;  %s62_s21 = ssub.s32 %s3938_s16, %s4749_s18 }
   0xc   : > { %s171_s22 = sand.u32 1, %s3942_s17   ;;  %p63_p6 = scmp.eq.s32.totalorder %s62_s21, 0 }
   0xd   : > { %s173_s23 = sand.u32 1, %s3930_s14   ;;  %s3427_s24 = sshll.u32 %s3938_s16, 4 }
   0xe   : > { %s4020_s25 = scalar_select %p63_p6, %s3930_s14, %s65_s19  }
   0xf   : > { %s2388_s26 = sshll.u32 %s173_s23, 11  ;;  %s180_s29 = scalar_lea.hbm %s4734_s1, %s3427_s24 }
  0x10   : > { %s181_s30 = sshll.u32 %s180_s29, 4  ;;  %s175_s4 = scalar_lea.vmem [#allocation5], %s2388_s26  ;;  %s182_s30 = int_to_ptr.hbm [resolvable:$true] %s181_s30 }
  0x11   : > { %s183_s5 = sshll.u32 %s175_s4, 4  ;;  %p4031_p7 = pnand %p3711_p5, %p4009_p4  ;;  %s184_s5 = int_to_ptr.vmem [resolvable:$true] %s183_s5 }
  0x12   : > { %s4035_s7 = scalar_lea.sflag [#allocation6], %s171_s22  ;;  %s3944_s8 = smov 512  }
  0x13   : > { %s3945_s9 = smov 256   ;;  %s3946_s10 = smov 16  }
  0x14   : > { %3702 = dma.hbm_to_vmem [thread:$0]  (!%p4031_p7), %s182_s30, 32768, %s184_s5, %s4035_s7, %s3944_s8, %s3945_s9, %s3946_s10  }
  0x15   : > { %s4041_s11 = sadd.s32 4294967295, %s3942_s17   ;;  %s2384_s19 = sadd.s32 4294967294, %s3942_s17  }
  0x16   : > { %p78_p8 = scmp.ne.s32.totalorder %s3926_s13, %s3922_s12  ;;  %p79_p9 = scmp.eq.s32.totalorder %s4041_s11, 0 }
  0x17   : > { %p130_p10 = scmp.eq.s32.totalorder %s4041_s11, 1  ;;  %p136_p11 = scmp.eq.s32.totalorder %s2384_s19, 1 }
  0x18   : > { %p4050_p12 = por %p79_p9, %p78_p8  ;;  %p2385_p13 = scmp.ge.s32.totalorder %s3942_s17, 1 }
  0x19   : > { %p4058_p0 = por %p130_p10, %p72_p1  ;;  %p4062_p2 = por %p136_p11, %p78_p8 }
  0x1a   : > { %p143_p4 = scmp.lt.s32.totalorder %s3942_s17, 3  ;;  %s158_s27 = sshll.u32 %s4733_s0, 4  ;;  %s159_s27 = int_to_ptr.hbm [resolvable:$true] %s158_s27 }
  0x1b   : > { %s3947_s29 = smov [#allocation2]   ;;  %s2391_s4 = sshll.u32 %s173_s23, 2 }
  0x1c   : > { %p4070_p5 = pnand %p2385_p13, %p143_p4  ;;  %s160_s30 = sshll.u32 %s3947_s29, 4  ;;  %s161_s30 = int_to_ptr.vmem [resolvable:$true] %s160_s30 }
  0x1d   : > { %s2392_s5 = sshll.u32 %s3938_s16, 2  ;;  %s197_s24 = scalar_lea.vmem [#allocation7], %s2391_s4 }
  0x1e   : > { %p3695_p1 = pneg %p4070_p5  ;;  %s201_s10 = scalar_lea.hbm %s4735_s2, %s2392_s5 }
  0x1f   : > { %s203_s19 = sshll.u32 %s201_s10, 4  ;;  %s205_s26 = sshll.u32 %s197_s24, 4  ;;  %s204_s19 = int_to_ptr.hbm [resolvable:$true] %s203_s19  ;;  %s206_s26 = int_to_ptr.vmem [resolvable:$true] %s205_s26 }
  0x20   : > { %p3696_p6 = pnand %p3695_p1, %p79_p9  ;;  %214 = sbr.rel (%p4070_p5) target bundleno = 444 (0x1bc), region = 32 }
  0x21   : > { %3705 = dma.hbm_to_vmem [thread:$0]  (!%p4031_p7), %s204_s19, 64, %s206_s26, %s4035_s7  }
  0x22   : > { %3698 = dma.hbm_to_vmem [thread:$0]  (!%p3696_p6), %s159_s27, 1024, %s161_s30, [#allocation3]  }
  0x25   : > { %3909 = dma.done.wait (%p79_p9), [#allocation3], 1024  }
  0x26   : > { %3911 = vsyncadd (%p79_p9), [#allocation3], 4294966272  ;;  %s221_s23 = sand.u32 1, %s4041_s11   ;;  %s4095_s29 = sand.u32 1, %s3926_s13  }
  0x27   : > { %s2395_s27 = sshll.u32 %s4095_s29, 11  ;;  %s222_s30 = scalar_lea.sflag [#allocation6], %s221_s23 }
  0x28   : > { %s4098_s6 = scalar_lea.vmem [#allocation5], %s2395_s27 }
  0x29   : > { %3913 = dma.done.wait (%p4050_p12), %s222_s30, 32832  }
  0x2a   : > { %3915 = vsyncadd (%p4050_p12), %s222_s30, 4294934464  ;;  %v2512_v0 = vld [vmem:[%s4098_s6 + $0xe0] sm:$0xf]  ;;  %v3458_v1 = vld [vmem:[%s4098_s6 + $0xec] sm:$0xf0]  ;;  %s2396_s7 = sshll.u32 %s4095_s29, 2 }
  0x2b   : > { %v2640_v2 = vld [vmem:[%s4098_s6 + $0x1e0] sm:$0xf]  ;;  %v2513_v3 = vor.u32 %v3458_v1, %v2512_v0  ;;  %v3490_v4 = vld [vmem:[%s4098_s6 + $0x1ec] sm:$0xf0]  ;;  %s235_s11 = scalar_lea.vmem [#allocation7], %s2396_s7  ;;  %s2397_s20 = sshll.u32 %s4095_s29, 5 }
  0x2c   : > { %v2768_v5 = vld [vmem:[%s4098_s6 + $0x2e0] sm:$0xf]  ;;  %v3522_v6 = vld [vmem:[%s4098_s6 + $0x2ec] sm:$0xf0]  ;;  %v2641_v7 = vor.u32 %v3490_v4, %v2640_v2  ;;  %s4594_s28 = scalar_lea.vmem [#allocation8], %s2397_s20  ;;  %s3684_s4 = sshll.u32 %s3934_s15, 5 }
  0x2d   : > { %v2769_v8 = vor.u32 %v3522_v6, %v2768_v5  ;;  %v2896_v9 = vld [vmem:[%s4098_s6 + $0x3e0] sm:$0xf]  ;;  %v3554_v10 = vld [vmem:[%s4098_s6 + $0x3ec] sm:$0xf0]  ;;  %1829 = vmatpush.bf16.msra.mxu0 %v2513_v3  ;;  %s2263_s9 = scalar_lea.hbm %s4736_s3, %s3684_s4  ;;  %s2265_s10 = sshll.u32 %s4594_s28, 4  ;;  %s2266_s10 = int_to_ptr.vmem [resolvable:$true] %s2265_s10 }
  0x2e   : > { %v2496_v11 = vld [vmem:[%s4098_s6 + $0xc0] sm:$0xf]  ;;  %v2897_v12 = vor.u32 %v3554_v10, %v2896_v9  ;;  %v3454_v13 = vld [vmem:[%s4098_s6 + $0xcc] sm:$0xf0]  ;;  %1842 = vmatpush.bf16.msra.mxu1 %v2641_v7  ;;  %s2267_s19 = sshll.u32 %s2263_s9, 4  ;;  %s2250_s24 = scalar_lea.sflag [#allocation4], %s4095_s29  ;;  %s2268_s19 = int_to_ptr.hbm [resolvable:$true] %s2267_s19 }
  0x2f   : > { %v2624_v14 = vld [vmem:[%s4098_s6 + $0x1c0] sm:$0xf]  ;;  %v3486_v15 = vld [vmem:[%s4098_s6 + $0x1cc] sm:$0xf0]  ;;  %1855 = vmatpush.bf16.msra.mxu2 %v2769_v8  ;;  %v2497_v16 = vor.u32 %v3454_v13, %v2496_v11  ;;  %s3870_s15 = sshra.s32 %s2268_s19, 4  ;;  %s3876_s30 = scalar_lea.hbm %s4736_s3, 64  ;;  %s3871_s15 = int_to_ptr.hbm [resolvable:$true] %s3870_s15 }
  0x30   : > { %v2625_v17 = vor.u32 %v3486_v15, %v2624_v14  ;;  %v2752_v18 = vld [vmem:[%s4098_s6 + $0x2c0] sm:$0xf]  ;;  %v3518_v19 = vld [vmem:[%s4098_s6 + $0x2cc] sm:$0xf0]  ;;  %1868 = vmatpush.bf16.msra.mxu3 %v2897_v12  ;;  %s3872_s26 = scalar_lea.hbm %s3871_s15, 32  ;;  %p3877_p10 = scmp.lt.s32.totalorder %s3871_s15, %s4736_s3 }
  0x31   : > { %v2880_v20 = vld [vmem:[%s4098_s6 + $0x3c0] sm:$0xf]  ;;  %v2753_v21 = vor.u32 %v3518_v19, %v2752_v18  ;;  %v3550_v22 = vld [vmem:[%s4098_s6 + $0x3cc] sm:$0xf0]  ;;  %1830 = vmatpush.bf16.msra.mxu0 %v2497_v16  ;;  %p3873_p7 = scmp.ne.s32.totalorder %s3871_s15, %s3872_s26  ;;  %p3878_p11 = scmp.lt.s32.totalorder %s3876_s30, %s3872_s26 }
  0x32   : > { %v2480_v23 = vld [vmem:[%s4098_s6 + $0xa0] sm:$0xf]  ;;  %v3450_v24 = vld [vmem:[%s4098_s6 + $0xac] sm:$0xf0]  ;;  %v2881_v25 = vor.u32 %v3550_v22, %v2880_v20  ;;  %1843 = vmatpush.bf16.msra.mxu1 %v2625_v17 }
  0x33   : > { %v2608_v26 = vld [vmem:[%s4098_s6 + $0x1a0] sm:$0xf]  ;;  %v3482_v27 = vld [vmem:[%s4098_s6 + $0x1ac] sm:$0xf0]  ;;  %v2481_v29 = vor.u32 %v3450_v24, %v2480_v23  ;;  %1856 = vmatpush.bf16.msra.mxu2 %v2753_v21  ;;  %p3874_p8 = pnand %p3873_p7, %p4058_p0  ;;  %p3879_p12 = por %p3878_p11, %p3877_p10 }
  0x34   : > { %v2736_v28 = vld [vmem:[%s4098_s6 + $0x2a0] sm:$0xf]  ;;  %v3514_v30 = vld [vmem:[%s4098_s6 + $0x2ac] sm:$0xf0]  ;;  %v2609_v33 = vor.u32 %v3482_v27, %v2608_v26  ;;  %1869 = vmatpush.bf16.msra.mxu3 %v2881_v25 }
  0x35   : > { %v2864_v31 = vld [vmem:[%s4098_s6 + $0x3a0] sm:$0xf]  ;;  %v3546_v32 = vld [vmem:[%s4098_s6 + $0x3ac] sm:$0xf0]  ;;  %v2737_v34 = vor.u32 %v3514_v30, %v2736_v28  ;;  %1831 = vmatpush.bf16.msra.mxu0 %v2481_v29  ;;  %p3875_p9 = pneg %p3874_p8 }
  0x36   : > { %v2464_v35 = vld [vmem:[%s4098_s6 + $0x80] sm:$0xf]  ;;  %v3446_v36 = vld [vmem:[%s4098_s6 + $0x8c] sm:$0xf0]  ;;  %v2865_v38 = vor.u32 %v3546_v32, %v2864_v31  ;;  %1844 = vmatpush.bf16.msra.mxu1 %v2609_v33 }
  0x37   : > { %v2592_v37 = vld [vmem:[%s4098_s6 + $0x180] sm:$0xf]  ;;  %v3478_v39 = vld [vmem:[%s4098_s6 + $0x18c] sm:$0xf0]  ;;  %v2465_v44 = vor.u32 %v3446_v36, %v2464_v35  ;;  %1857 = vmatpush.bf16.msra.mxu2 %v2737_v34  ;;  %p3880_p13 = pnand %p3879_p12, %p3875_p9 }
  0x38   : > { %v2720_v40 = vld [vmem:[%s4098_s6 + $0x280] sm:$0xf]  ;;  %v3510_v41 = vld [vmem:[%s4098_s6 + $0x28c] sm:$0xf0]  ;;  %v2593_v45 = vor.u32 %v3478_v39, %v2592_v37  ;;  %1870 = vmatpush.bf16.msra.mxu3 %v2865_v38 }
  0x39   : > { %v2848_v42 = vld [vmem:[%s4098_s6 + $0x380] sm:$0xf]  ;;  %v3542_v43 = vld [vmem:[%s4098_s6 + $0x38c] sm:$0xf0]  ;;  %v2721_v46 = vor.u32 %v3510_v41, %v2720_v40  ;;  %1832 = vmatpush.bf16.msra.mxu0 %v2465_v44 }
  0x3a   : > { %v2448_v47 = vld [vmem:[%s4098_s6 + $0x60] sm:$0xf]  ;;  %v3442_v48 = vld [vmem:[%s4098_s6 + $0x6c] sm:$0xf0]  ;;  %v2849_v50 = vor.u32 %v3542_v43, %v2848_v42  ;;  %1845 = vmatpush.bf16.msra.mxu1 %v2593_v45 }
  0x3b   : > { %v2576_v49 = vld [vmem:[%s4098_s6 + $0x160] sm:$0xf]  ;;  %v3474_v51 = vld [vmem:[%s4098_s6 + $0x16c] sm:$0xf0]  ;;  %v2449_v56 = vor.u32 %v3442_v48, %v2448_v47  ;;  %1858 = vmatpush.bf16.msra.mxu2 %v2721_v46 }
  0x3c   : > { %v2704_v52 = vld [vmem:[%s4098_s6 + $0x260] sm:$0xf]  ;;  %v3506_v53 = vld [vmem:[%s4098_s6 + $0x26c] sm:$0xf0]  ;;  %v2577_v57 = vor.u32 %v3474_v51, %v2576_v49  ;;  %1871 = vmatpush.bf16.msra.mxu3 %v2849_v50 }
  0x3d   : > { %v2832_v54 = vld [vmem:[%s4098_s6 + $0x360] sm:$0xf]  ;;  %v3538_v55 = vld [vmem:[%s4098_s6 + $0x36c] sm:$0xf0]  ;;  %v2705_v58 = vor.u32 %v3506_v53, %v2704_v52  ;;  %1833 = vmatpush.bf16.msra.mxu0 %v2449_v56 }
  0x3e   : > { %v2432_v59 = vld [vmem:[%s4098_s6 + $0x40] sm:$0xf]  ;;  %v3438_v60 = vld [vmem:[%s4098_s6 + $0x4c] sm:$0xf0]  ;;  %v2833_v62 = vor.u32 %v3538_v55, %v2832_v54  ;;  %1846 = vmatpush.bf16.msra.mxu1 %v2577_v57 }
  0x3f   : > { %v2560_v61 = vld [vmem:[%s4098_s6 + $0x140] sm:$0xf]  ;;  %v3470_v63 = vld [vmem:[%s4098_s6 + $0x14c] sm:$0xf0]  ;;  %v2433_v4 = vor.u32 %v3438_v60, %v2432_v59  ;;  %1859 = vmatpush.bf16.msra.mxu2 %v2705_v58 }
  0x40   : > { %v2688_v0 = vld [vmem:[%s4098_s6 + $0x240] sm:$0xf]  ;;  %v3502_v1 = vld [vmem:[%s4098_s6 + $0x24c] sm:$0xf0]  ;;  %v2561_v5 = vor.u32 %v3470_v63, %v2560_v61  ;;  %1872 = vmatpush.bf16.msra.mxu3 %v2833_v62 }
  0x41   : > { %v2816_v2 = vld [vmem:[%s4098_s6 + $0x340] sm:$0xf]  ;;  %v3534_v3 = vld [vmem:[%s4098_s6 + $0x34c] sm:$0xf0]  ;;  %v2689_v6 = vor.u32 %v3502_v1, %v2688_v0  ;;  %1834 = vmatpush.bf16.msra.mxu0 %v2433_v4 }
  0x42   : > { %v2416_v7 = vld [vmem:[%s4098_s6 + $0x20] sm:$0xf]  ;;  %v3434_v8 = vld [vmem:[%s4098_s6 + $0x2c] sm:$0xf0]  ;;  %v2817_v10 = vor.u32 %v3534_v3, %v2816_v2  ;;  %1847 = vmatpush.bf16.msra.mxu1 %v2561_v5 }
  0x43   : > { %v2544_v9 = vld [vmem:[%s4098_s6 + $0x120] sm:$0xf]  ;;  %v3466_v11 = vld [vmem:[%s4098_s6 + $0x12c] sm:$0xf0]  ;;  %v2417_v16 = vor.u32 %v3434_v8, %v2416_v7  ;;  %1860 = vmatpush.bf16.msra.mxu2 %v2689_v6 }
  0x44   : > { %v2672_v12 = vld [vmem:[%s4098_s6 + $0x220] sm:$0xf]  ;;  %v3498_v13 = vld [vmem:[%s4098_s6 + $0x22c] sm:$0xf0]  ;;  %v2545_v19 = vor.u32 %v3466_v11, %v2544_v9  ;;  %1873 = vmatpush.bf16.msra.mxu3 %v2817_v10  ;;  %v270_v10 = vld [vmem:[#allocation2 + $0x18] sm:$0xff] }
  0x45   : > { %v2800_v14 = vld [vmem:[%s4098_s6 + $0x320] sm:$0xf]  ;;  %v3530_v15 = vld [vmem:[%s4098_s6 + $0x32c] sm:$0xf0]  ;;  %v2673_v20 = vor.u32 %v3498_v13, %v2672_v12  ;;  %1835 = vmatpush.bf16.msra.mxu0 %v2417_v16  ;;  %v268_v11 = vld [vmem:[#allocation2 + $0x8] sm:$0xff]  ;;  %v4203_v16 = vpack.c.bf16 %v270_v10, %v270_v10 }
  0x46   : > { %v2400_v17 = vld [vmem:[%s4098_s6] sm:$0xf]  ;;  %v3430_v18 = vld [vmem:[%s4098_s6 + $0xc] sm:$0xf0]  ;;  %v2801_v24 = vor.u32 %v3530_v15, %v2800_v14  ;;  %1848 = vmatpush.bf16.msra.mxu1 %v2545_v19  ;;  %v2642_v10 = vld [vmem:[%s4098_s6 + $0x1f0] sm:$0xf0] }
  0x47   : > { %v2528_v21 = vld [vmem:[%s4098_s6 + $0x100] sm:$0xf]  ;;  %v3462_v22 = vld [vmem:[%s4098_s6 + $0x10c] sm:$0xf0]  ;;  %v2401_v31 = vor.u32 %v3430_v18, %v2400_v17  ;;  %1861 = vmatpush.bf16.msra.mxu2 %v2673_v20  ;;  %v4205_v17 = vpack.c.bf16 %v268_v11, %v268_v11  ;;  %v3520_v11 = vld [vmem:[%s4098_s6 + $0x2e4] sm:$0xf] }
  0x48   : > { %v2656_v23 = vld [vmem:[%s4098_s6 + $0x200] sm:$0xf]  ;;  %v3494_v25 = vld [vmem:[%s4098_s6 + $0x20c] sm:$0xf0]  ;;  %v2529_v35 = vor.u32 %v3462_v22, %v2528_v21  ;;  %1874 = vmatpush.bf16.msra.mxu3 %v2801_v24 }
  0x49   : > { %v2784_v26 = vld [vmem:[%s4098_s6 + $0x300] sm:$0xf]  ;;  %v3526_v27 = vld [vmem:[%s4098_s6 + $0x30c] sm:$0xf0]  ;;  %v2657_v36 = vor.u32 %v3494_v25, %v2656_v23  ;;  %1836 = vmatpush.bf16.msra.mxu0 %v2401_v31 }
  0x4a   : > { %v3024_v28 = vld [vmem:[%s4098_s6 + $0x4e0] sm:$0xf]  ;;  %v3586_v29 = vld [vmem:[%s4098_s6 + $0x4ec] sm:$0xf0]  ;;  %v2785_v39 = vor.u32 %v3526_v27, %v2784_v26  ;;  %1849 = vmatpush.bf16.msra.mxu1 %v2529_v35 }
  0x4b   : > { %v3152_v30 = vld [vmem:[%s4098_s6 + $0x5e0] sm:$0xf]  ;;  %v3618_v32 = vld [vmem:[%s4098_s6 + $0x5ec] sm:$0xf0]  ;;  %v3025_v40 = vor.u32 %v3586_v29, %v3024_v28  ;;  %1862 = vmatpush.bf16.msra.mxu2 %v2657_v36 }
  0x4c   : > { %v3280_v33 = vld [vmem:[%s4098_s6 + $0x6e0] sm:$0xf]  ;;  %v3650_v34 = vld [vmem:[%s4098_s6 + $0x6ec] sm:$0xf0]  ;;  %v3153_v41 = vor.u32 %v3618_v32, %v3152_v30  ;;  %1875 = vmatpush.bf16.msra.mxu3 %v2785_v39 }
  0x4d   : > { %v3408_v37 = vld [vmem:[%s4098_s6 + $0x7e0] sm:$0xf]  ;;  %v3682_v38 = vld [vmem:[%s4098_s6 + $0x7ec] sm:$0xf0]  ;;  %v3281_v42 = vor.u32 %v3650_v34, %v3280_v33  ;;  %1881 = vmatpush.bf16.msrb.mxu0 %v3025_v40  ;;  %1850 = vmatmul.bf16.vlgmr.msra.gmra.mxu1 %v4205_v17 }
  0x4e   : > { %v3008_v43 = vld [vmem:[%s4098_s6 + $0x4c0] sm:$0xf]  ;;  %v3582_v44 = vld [vmem:[%s4098_s6 + $0x4cc] sm:$0xf0]  ;;  %v3409_v46 = vor.u32 %v3682_v38, %v3408_v37  ;;  %1894 = vmatpush.bf16.msrb.mxu1 %v3153_v41 }
  0x4f   : > { %v3136_v45 = vld [vmem:[%s4098_s6 + $0x5c0] sm:$0xf]  ;;  %v3614_v47 = vld [vmem:[%s4098_s6 + $0x5cc] sm:$0xf0]  ;;  %v3009_v52 = vor.u32 %v3582_v44, %v3008_v43  ;;  %1907 = vmatpush.bf16.msrb.mxu2 %v3281_v42  ;;  %1876 = vmatmul.bf16.vlgmr.msra.gmra.mxu3 %v4203_v16 }
  0x50   : > { %v3264_v48 = vld [vmem:[%s4098_s6 + $0x6c0] sm:$0xf]  ;;  %v3646_v49 = vld [vmem:[%s4098_s6 + $0x6cc] sm:$0xf0]  ;;  %v3137_v54 = vor.u32 %v3614_v47, %v3136_v45  ;;  %1920 = vmatpush.bf16.msrb.mxu3 %v3409_v46 }
  0x51   : > { %v3392_v50 = vld [vmem:[%s4098_s6 + $0x7c0] sm:$0xf]  ;;  %v3678_v51 = vld [vmem:[%s4098_s6 + $0x7cc] sm:$0xf0]  ;;  %v3265_v55 = vor.u32 %v3646_v49, %v3264_v48  ;;  %1882 = vmatpush.bf16.msrb.mxu0 %v3009_v52 }
  0x52   : > { %v2992_v53 = vld [vmem:[%s4098_s6 + $0x4a0] sm:$0xf]  ;;  %v3578_v56 = vld [vmem:[%s4098_s6 + $0x4ac] sm:$0xf0]  ;;  %v3393_v59 = vor.u32 %v3678_v51, %v3392_v50  ;;  %1895 = vmatpush.bf16.msrb.mxu1 %v3137_v54 }
  0x53   : > { %v3120_v57 = vld [vmem:[%s4098_s6 + $0x5a0] sm:$0xf]  ;;  %v269_v58 = vld [vmem:[#allocation2 + $0x10] sm:$0xff]  ;;  %v2993_v2 = vor.u32 %v3578_v56, %v2992_v53  ;;  %1908 = vmatpush.bf16.msrb.mxu2 %v3265_v55 }
  0x54   : > { %v3610_v60 = vld [vmem:[%s4098_s6 + $0x5ac] sm:$0xf0]  ;;  %v3248_v61 = vld [vmem:[%s4098_s6 + $0x6a0] sm:$0xf]  ;;  %v4190_v63 = vpack.c.bf16 %v269_v58, %v269_v58  ;;  %1921 = vmatpush.bf16.msrb.mxu3 %v3393_v59 }
  0x55   : > { %v3642_v62 = vld [vmem:[%s4098_s6 + $0x6ac] sm:$0xf0]  ;;  %v3376_v0 = vld [vmem:[%s4098_s6 + $0x7a0] sm:$0xf]  ;;  %v3121_v6 = vor.u32 %v3610_v60, %v3120_v57  ;;  %1883 = vmatpush.bf16.msrb.mxu0 %v2993_v2 }
  0x56   : > { %v3674_v1 = vld [vmem:[%s4098_s6 + $0x7ac] sm:$0xf0]  ;;  %v2976_v3 = vld [vmem:[%s4098_s6 + $0x480] sm:$0xf]  ;;  %1863 = vmatmul.bf16.vlgmr.msra.gmra.mxu2 %v4190_v63  ;;  %v3249_v7 = vor.u32 %v3642_v62, %v3248_v61 }
  0x57   : > { %v3574_v4 = vld [vmem:[%s4098_s6 + $0x48c] sm:$0xf0]  ;;  %v267_v5 = vld [vmem:[#allocation2] sm:$0xff]  ;;  %v3377_v12 = vor.u32 %v3674_v1, %v3376_v0  ;;  %1896 = vmatpush.bf16.msrb.mxu1 %v3121_v6  ;;  %v2514_v6 = vld [vmem:[%s4098_s6 + $0xf0] sm:$0xf0] }
  0x58   : > { %v3104_v8 = vld [vmem:[%s4098_s6 + $0x580] sm:$0xf]  ;;  %v4198_v9 = vpack.c.bf16 %v267_v5, %v267_v5  ;;  %v3606_v13 = vld [vmem:[%s4098_s6 + $0x58c] sm:$0xf0]  ;;  %v2977_v20 = vor.u32 %v3574_v4, %v2976_v3  ;;  %1909 = vmatpush.bf16.msrb.mxu2 %v3249_v7  ;;  %v3456_v5 = vld [vmem:[%s4098_s6 + $0xe4] sm:$0xf] }
  0x59   : > { %v3232_v14 = vld [vmem:[%s4098_s6 + $0x680] sm:$0xf]  ;;  %v3638_v15 = vld [vmem:[%s4098_s6 + $0x68c] sm:$0xf0]  ;;  %v3105_v21 = vor.u32 %v3606_v13, %v3104_v8  ;;  %1922 = vmatpush.bf16.msrb.mxu3 %v3377_v12  ;;  %v3488_v7 = vld [vmem:[%s4098_s6 + $0x1e4] sm:$0xf] }
  0x5a   : > { %v3360_v18 = vld [vmem:[%s4098_s6 + $0x780] sm:$0xf]  ;;  %v3670_v19 = vld [vmem:[%s4098_s6 + $0x78c] sm:$0xf0]  ;;  %1837 = vmatmul.bf16.vlgmr.msra.gmra.mxu0 %v4198_v9  ;;  %v3233_v22 = vor.u32 %v3638_v15, %v3232_v14  ;;  %v2770_v12 = vld [vmem:[%s4098_s6 + $0x2f0] sm:$0xf0] }
  0x5b   : > { %v2960_v23 = vld [vmem:[%s4098_s6 + $0x460] sm:$0xf]  ;;  %v3570_v24 = vld [vmem:[%s4098_s6 + $0x46c] sm:$0xf0]  ;;  %v3361_v26 = vor.u32 %v3670_v19, %v3360_v18  ;;  %1884 = vmatpush.bf16.msrb.mxu0 %v2977_v20  ;;  %1897 = vmatpush.bf16.msrb.mxu1 %v3105_v21  ;;  %v3552_v15 = vld [vmem:[%s4098_s6 + $0x3e4] sm:$0xf]  ;;  %v2517_v21 = vor.u32 %v3456_v5, %v2514_v6 }
  0x5c   : > { %v3088_v25 = vld [vmem:[%s4098_s6 + $0x560] sm:$0xf]  ;;  %v3602_v27 = vld [vmem:[%s4098_s6 + $0x56c] sm:$0xf0]  ;;  %v2961_v32 = vor.u32 %v3570_v24, %v2960_v23  ;;  %1910 = vmatpush.bf16.msrb.mxu2 %v3233_v22  ;;  %v2898_v18 = vld [vmem:[%s4098_s6 + $0x3f0] sm:$0xf0] }
  0x5d   : > { %v3216_v28 = vld [vmem:[%s4098_s6 + $0x660] sm:$0xf]  ;;  %v3634_v29 = vld [vmem:[%s4098_s6 + $0x66c] sm:$0xf0]  ;;  %v3089_v33 = vor.u32 %v3602_v27, %v3088_v25  ;;  %1923 = vmatpush.bf16.msrb.mxu3 %v3361_v26  ;;  %v3452_v22 = vld [vmem:[%s4098_s6 + $0xc4] sm:$0xf]  ;;  %v2645_v25 = vor.u32 %v3488_v7, %v2642_v10  ;;  %v2773_v26 = vor.u32 %v3520_v11, %v2770_v12 }
  0x5e   : > { %v3344_v30 = vld [vmem:[%s4098_s6 + $0x760] sm:$0xf]  ;;  %v3666_v31 = vld [vmem:[%s4098_s6 + $0x76c] sm:$0xf0]  ;;  %v3217_v34 = vor.u32 %v3634_v29, %v3216_v28  ;;  %v274_v24 = vld [vmem:[#allocation2 + $0x38] sm:$0xff] }
  0x5f   : > { %v2944_v35 = vld [vmem:[%s4098_s6 + $0x440] sm:$0xf]  ;;  %v3566_v36 = vld [vmem:[%s4098_s6 + $0x44c] sm:$0xf0]  ;;  %v3345_v38 = vor.u32 %v3666_v31, %v3344_v30  ;;  %1885 = vmatpush.bf16.msrb.mxu0 %v2961_v32  ;;  %1898 = vmatpush.bf16.msrb.mxu1 %v3089_v33  ;;  %v2498_v27 = vld [vmem:[%s4098_s6 + $0xd0] sm:$0xf0]  ;;  %v2901_v30 = vor.u32 %v3552_v15, %v2898_v18 }
  0x60   : > { %v3072_v37 = vld [vmem:[%s4098_s6 + $0x540] sm:$0xf]  ;;  %v3598_v39 = vld [vmem:[%s4098_s6 + $0x54c] sm:$0xf0]  ;;  %v2945_v44 = vor.u32 %v3566_v36, %v2944_v35  ;;  %1911 = vmatpush.bf16.msrb.mxu2 %v3217_v34  ;;  %v3484_v28 = vld [vmem:[%s4098_s6 + $0x1c4] sm:$0xf] }
  0x61   : > { %v3200_v40 = vld [vmem:[%s4098_s6 + $0x640] sm:$0xf]  ;;  %v3630_v41 = vld [vmem:[%s4098_s6 + $0x64c] sm:$0xf0]  ;;  %v3073_v45 = vor.u32 %v3598_v39, %v3072_v37  ;;  %1924 = vmatpush.bf16.msrb.mxu3 %v3345_v38  ;;  %v272_v29 = vld [vmem:[#allocation2 + $0x28] sm:$0xff]  ;;  %v4264_v38 = vpack.c.bf16 %v274_v24, %v274_v24  ;;  %v2501_v39 = vor.u32 %v3452_v22, %v2498_v27 }
  0x62   : > { %v3328_v42 = vld [vmem:[%s4098_s6 + $0x740] sm:$0xf]  ;;  %v3662_v43 = vld [vmem:[%s4098_s6 + $0x74c] sm:$0xf0]  ;;  %v3201_v46 = vor.u32 %v3630_v41, %v3200_v40  ;;  %v2626_v31 = vld [vmem:[%s4098_s6 + $0x1d0] sm:$0xf0]  ;;  %v4266_v40 = vpack.c.bf16 %v272_v29, %v272_v29 }
  0x63   : > { %v2928_v47 = vld [vmem:[%s4098_s6 + $0x420] sm:$0xf]  ;;  %v3562_v48 = vld [vmem:[%s4098_s6 + $0x42c] sm:$0xf0]  ;;  %v3329_v50 = vor.u32 %v3662_v43, %v3328_v42  ;;  %1886 = vmatpush.bf16.msrb.mxu0 %v2945_v44  ;;  %1899 = vmatpush.bf16.msrb.mxu1 %v3073_v45  ;;  %v3516_v32 = vld [vmem:[%s4098_s6 + $0x2c4] sm:$0xf]  ;;  %v2629_v41 = vor.u32 %v3484_v28, %v2626_v31 }
  0x64   : > { %v3056_v49 = vld [vmem:[%s4098_s6 + $0x520] sm:$0xf]  ;;  %v3594_v51 = vld [vmem:[%s4098_s6 + $0x52c] sm:$0xf0]  ;;  %v2929_v56 = vor.u32 %v3562_v48, %v2928_v47  ;;  %1912 = vmatpush.bf16.msrb.mxu2 %v3201_v46  ;;  %v2754_v33 = vld [vmem:[%s4098_s6 + $0x2d0] sm:$0xf0] }
  0x65   : > { %v3184_v52 = vld [vmem:[%s4098_s6 + $0x620] sm:$0xf]  ;;  %v3626_v53 = vld [vmem:[%s4098_s6 + $0x62c] sm:$0xf0]  ;;  %v3057_v59 = vor.u32 %v3594_v51, %v3056_v49  ;;  %1925 = vmatpush.bf16.msrb.mxu3 %v3329_v50  ;;  %v3548_v35 = vld [vmem:[%s4098_s6 + $0x3c4] sm:$0xf]  ;;  %v2757_v42 = vor.u32 %v3516_v32, %v2754_v33 }
  0x66   : > { %v3312_v54 = vld [vmem:[%s4098_s6 + $0x720] sm:$0xf]  ;;  %v3658_v55 = vld [vmem:[%s4098_s6 + $0x72c] sm:$0xf0]  ;;  %v3185_v60 = vor.u32 %v3626_v53, %v3184_v52  ;;  %v2882_v36 = vld [vmem:[%s4098_s6 + $0x3d0] sm:$0xf0] }
  0x67   : > { %v2912_v57 = vld [vmem:[%s4098_s6 + $0x400] sm:$0xf]  ;;  %v3558_v58 = vld [vmem:[%s4098_s6 + $0x40c] sm:$0xf0]  ;;  %v3313_v1 = vor.u32 %v3658_v55, %v3312_v54  ;;  %1887 = vmatpush.bf16.msrb.mxu0 %v2929_v56  ;;  %1900 = vmatpush.bf16.msrb.mxu1 %v3057_v59  ;;  %v3448_v43 = vld [vmem:[%s4098_s6 + $0xa4] sm:$0xf]  ;;  %v2885_v46 = vor.u32 %v3548_v35, %v2882_v36 }
  0x68   : > { %v3040_v61 = vld [vmem:[%s4098_s6 + $0x500] sm:$0xf]  ;;  %v3590_v62 = vld [vmem:[%s4098_s6 + $0x50c] sm:$0xf0]  ;;  %v2913_v8 = vor.u32 %v3558_v58, %v2912_v57  ;;  %1913 = vmatpush.bf16.msrb.mxu2 %v3185_v60  ;;  %v2482_v44 = vld [vmem:[%s4098_s6 + $0xb0] sm:$0xf0] }
  0x69   : > { %v3168_v0 = vld [vmem:[%s4098_s6 + $0x600] sm:$0xf]  ;;  %v3622_v2 = vld [vmem:[%s4098_s6 + $0x60c] sm:$0xf0]  ;;  %v3041_v13 = vor.u32 %v3590_v62, %v3040_v61  ;;  %1926 = vmatpush.bf16.msrb.mxu3 %v3313_v1  ;;  %v3480_v45 = vld [vmem:[%s4098_s6 + $0x1a4] sm:$0xf]  ;;  %v2485_v52 = vor.u32 %v3448_v43, %v2482_v44 }
  0x6a   : > { %v3296_v3 = vld [vmem:[%s4098_s6 + $0x700] sm:$0xf]  ;;  %v3654_v4 = vld [vmem:[%s4098_s6 + $0x70c] sm:$0xf0]  ;;  %v3169_v14 = vor.u32 %v3622_v2, %v3168_v0  ;;  %v2610_v47 = vld [vmem:[%s4098_s6 + $0x1b0] sm:$0xf0] }
  0x6b   : > { %v273_v19 = vld [vmem:[#allocation2 + $0x30] sm:$0xff]  ;;  %v3297_v20 = vor.u32 %v3654_v4, %v3296_v3  ;;  %v271_v23 = vld [vmem:[#allocation2 + $0x20] sm:$0xff]  ;;  %1888 = vmatpush.bf16.msrb.mxu0 %v2913_v8  ;;  %1901 = vmatpush.bf16.msrb.mxu1 %v3041_v13  ;;  %v2613_v53 = vor.u32 %v3480_v45, %v2610_v47 }
  0x6c   : > { %v4258_v34 = vpack.c.bf16 %v273_v19, %v273_v19  ;;  %1914 = vmatpush.bf16.msrb.mxu2 %v3169_v14  ;;  %v4262_v37 = vpack.c.bf16 %v271_v23, %v271_v23  ;;  %v3512_v48 = vld [vmem:[%s4098_s6 + $0x2a4] sm:$0xf]  ;;  %v2738_v49 = vld [vmem:[%s4098_s6 + $0x2b0] sm:$0xf0] }
  0x6d   : > { %1927 = vmatpush.bf16.msrb.mxu3 %v3297_v20  ;;  %v3544_v50 = vld [vmem:[%s4098_s6 + $0x3a4] sm:$0xf]  ;;  %v2866_v51 = vld [vmem:[%s4098_s6 + $0x3b0] sm:$0xf0]  ;;  %v2741_v54 = vor.u32 %v3512_v48, %v2738_v49 }
  0x6e   : > { %1889 = vmatmul.bf16.vlgmr.msrb.gmra.mxu0 %v4262_v37  ;;  %1902 = vmatmul.bf16.vlgmr.msrb.gmra.mxu1 %v4266_v40  ;;  %v3444_v55 = vld [vmem:[%s4098_s6 + $0x84] sm:$0xf]  ;;  %v2466_v56 = vld [vmem:[%s4098_s6 + $0x90] sm:$0xf0]  ;;  %v2869_v58 = vor.u32 %v3544_v50, %v2866_v51 }
  0x6f   : > { %1933 = vmatpush.bf16.msra.mxu0 %v2517_v21  ;;  %1946 = vmatpush.bf16.msra.mxu1 %v2645_v25  ;;  %v3476_v57 = vld [vmem:[%s4098_s6 + $0x184] sm:$0xf]  ;;  %v2594_v59 = vld [vmem:[%s4098_s6 + $0x190] sm:$0xf0]  ;;  %v2469_v1 = vor.u32 %v3444_v55, %v2466_v56 }
  0x70   : > { %1959 = vmatpush.bf16.msra.mxu2 %v2773_v26  ;;  %1928 = vmatmul.bf16.vlgmr.msrb.gmra.mxu3 %v4264_v38  ;;  %v3508_v60 = vld [vmem:[%s4098_s6 + $0x284] sm:$0xf]  ;;  %v2722_v61 = vld [vmem:[%s4098_s6 + $0x290] sm:$0xf0]  ;;  %v2597_v2 = vor.u32 %v3476_v57, %v2594_v59 }
  0x71   : > { %1972 = vmatpush.bf16.msra.mxu3 %v2901_v30  ;;  %1915 = vmatmul.bf16.vlgmr.msrb.gmra.mxu2 %v4258_v34  ;;  %v3540_v62 = vld [vmem:[%s4098_s6 + $0x384] sm:$0xf]  ;;  %v2850_v0 = vld [vmem:[%s4098_s6 + $0x390] sm:$0xf0]  ;;  %v2725_v3 = vor.u32 %v3508_v60, %v2722_v61 }
  0x72   : > { %v3440_v4 = vld [vmem:[%s4098_s6 + $0x64] sm:$0xf]  ;;  %v2450_v5 = vld [vmem:[%s4098_s6 + $0x70] sm:$0xf0]  ;;  %v2853_v7 = vor.u32 %v3540_v62, %v2850_v0 }
  0x73   : > { %1934 = vmatpush.bf16.msra.mxu0 %v2501_v39  ;;  %1947 = vmatpush.bf16.msra.mxu1 %v2629_v41  ;;  %v3472_v6 = vld [vmem:[%s4098_s6 + $0x164] sm:$0xf]  ;;  %v2578_v8 = vld [vmem:[%s4098_s6 + $0x170] sm:$0xf0]  ;;  %v2453_v14 = vor.u32 %v3440_v4, %v2450_v5 }
  0x74   : > { %1960 = vmatpush.bf16.msra.mxu2 %v2757_v42  ;;  %v3504_v10 = vld [vmem:[%s4098_s6 + $0x264] sm:$0xf]  ;;  %v2706_v11 = vld [vmem:[%s4098_s6 + $0x270] sm:$0xf0]  ;;  %v2581_v15 = vor.u32 %v3472_v6, %v2578_v8 }
  0x75   : > { %1973 = vmatpush.bf16.msra.mxu3 %v2885_v46  ;;  %v3536_v12 = vld [vmem:[%s4098_s6 + $0x364] sm:$0xf]  ;;  %v2834_v13 = vld [vmem:[%s4098_s6 + $0x370] sm:$0xf0]  ;;  %v2709_v18 = vor.u32 %v3504_v10, %v2706_v11 }
  0x76   : > { %v3436_v19 = vld [vmem:[%s4098_s6 + $0x44] sm:$0xf]  ;;  %v2434_v20 = vld [vmem:[%s4098_s6 + $0x50] sm:$0xf0]  ;;  %v2837_v22 = vor.u32 %v3536_v12, %v2834_v13 }
  0x77   : > { %1935 = vmatpush.bf16.msra.mxu0 %v2485_v52  ;;  %1948 = vmatpush.bf16.msra.mxu1 %v2613_v53  ;;  %v3468_v21 = vld [vmem:[%s4098_s6 + $0x144] sm:$0xf]  ;;  %v2562_v23 = vld [vmem:[%s4098_s6 + $0x150] sm:$0xf0]  ;;  %v2437_v28 = vor.u32 %v3436_v19, %v2434_v20 }
  0x78   : > { %1961 = vmatpush.bf16.msra.mxu2 %v2741_v54  ;;  %v3500_v24 = vld [vmem:[%s4098_s6 + $0x244] sm:$0xf]  ;;  %v2690_v25 = vld [vmem:[%s4098_s6 + $0x250] sm:$0xf0]  ;;  %v2565_v29 = vor.u32 %v3468_v21, %v2562_v23 }
  0x79   : > { %1974 = vmatpush.bf16.msra.mxu3 %v2869_v58  ;;  %v3532_v26 = vld [vmem:[%s4098_s6 + $0x344] sm:$0xf]  ;;  %v2818_v27 = vld [vmem:[%s4098_s6 + $0x350] sm:$0xf0]  ;;  %v2693_v30 = vor.u32 %v3500_v24, %v2690_v25 }
  0x7a   : > { %v3432_v31 = vld [vmem:[%s4098_s6 + $0x24] sm:$0xf]  ;;  %v2418_v32 = vld [vmem:[%s4098_s6 + $0x30] sm:$0xf0]  ;;  %v2821_v35 = vor.u32 %v3532_v26, %v2818_v27 }
  0x7b   : > { %1936 = vmatpush.bf16.msra.mxu0 %v2469_v1  ;;  %1949 = vmatpush.bf16.msra.mxu1 %v2597_v2  ;;  %v3464_v33 = vld [vmem:[%s4098_s6 + $0x124] sm:$0xf]  ;;  %v2546_v36 = vld [vmem:[%s4098_s6 + $0x130] sm:$0xf0]  ;;  %v2421_v44 = vor.u32 %v3432_v31, %v2418_v32 }
  0x7c   : > { %1962 = vmatpush.bf16.msra.mxu2 %v2725_v3  ;;  %v3496_v39 = vld [vmem:[%s4098_s6 + $0x224] sm:$0xf]  ;;  %v2674_v41 = vld [vmem:[%s4098_s6 + $0x230] sm:$0xf0]  ;;  %v2549_v47 = vor.u32 %v3464_v33, %v2546_v36 }
  0x7d   : > { %1975 = vmatpush.bf16.msra.mxu3 %v2853_v7  ;;  %v3528_v42 = vld [vmem:[%s4098_s6 + $0x324] sm:$0xf]  ;;  %v2802_v43 = vld [vmem:[%s4098_s6 + $0x330] sm:$0xf0]  ;;  %v2677_v48 = vor.u32 %v3496_v39, %v2674_v41 }
  0x7e   : > { %v3428_v45 = vld [vmem:[%s4098_s6 + $0x4] sm:$0xf]  ;;  %v2402_v46 = vld [vmem:[%s4098_s6 + $0x10] sm:$0xf0]  ;;  %v2805_v52 = vor.u32 %v3528_v42, %v2802_v43 }
  0x7f   : > { %1937 = vmatpush.bf16.msra.mxu0 %v2453_v14  ;;  %1950 = vmatpush.bf16.msra.mxu1 %v2581_v15  ;;  %v3460_v49 = vld [vmem:[%s4098_s6 + $0x104] sm:$0xf]  ;;  %v2530_v50 = vld [vmem:[%s4098_s6 + $0x110] sm:$0xf0]  ;;  %v2405_v59 = vor.u32 %v3428_v45, %v2402_v46 }
  0x80   : > { %1963 = vmatpush.bf16.msra.mxu2 %v2709_v18  ;;  %v3492_v51 = vld [vmem:[%s4098_s6 + $0x204] sm:$0xf]  ;;  %v2658_v53 = vld [vmem:[%s4098_s6 + $0x210] sm:$0xf0]  ;;  %v2533_v0 = vor.u32 %v3460_v49, %v2530_v50 }
  0x81   : > { %1976 = vmatpush.bf16.msra.mxu3 %v2837_v22  ;;  %v3524_v54 = vld [vmem:[%s4098_s6 + $0x304] sm:$0xf]  ;;  %v2786_v55 = vld [vmem:[%s4098_s6 + $0x310] sm:$0xf0]  ;;  %v2661_v1 = vor.u32 %v3492_v51, %v2658_v53 }
  0x82   : > { %v3584_v56 = vld [vmem:[%s4098_s6 + $0x4e4] sm:$0xf]  ;;  %v3026_v57 = vld [vmem:[%s4098_s6 + $0x4f0] sm:$0xf0]  ;;  %v2789_v4 = vor.u32 %v3524_v54, %v2786_v55 }
  0x83   : > { %1938 = vmatpush.bf16.msra.mxu0 %v2437_v28  ;;  %1951 = vmatpush.bf16.msra.mxu1 %v2565_v29  ;;  %v3616_v58 = vld [vmem:[%s4098_s6 + $0x5e4] sm:$0xf]  ;;  %v3154_v60 = vld [vmem:[%s4098_s6 + $0x5f0] sm:$0xf0]  ;;  %v3029_v5 = vor.u32 %v3584_v56, %v3026_v57 }
  0x84   : > { %1964 = vmatpush.bf16.msra.mxu2 %v2693_v30  ;;  %v3648_v61 = vld [vmem:[%s4098_s6 + $0x6e4] sm:$0xf]  ;;  %v3282_v62 = vld [vmem:[%s4098_s6 + $0x6f0] sm:$0xf0]  ;;  %v3157_v6 = vor.u32 %v3616_v58, %v3154_v60 }
  0x85   : > { %1977 = vmatpush.bf16.msra.mxu3 %v2821_v35  ;;  %v3680_v2 = vld [vmem:[%s4098_s6 + $0x7e4] sm:$0xf]  ;;  %v3410_v3 = vld [vmem:[%s4098_s6 + $0x7f0] sm:$0xf0]  ;;  %v3285_v7 = vor.u32 %v3648_v61, %v3282_v62 }
  0x86   : > { %v3580_v8 = vld [vmem:[%s4098_s6 + $0x4c4] sm:$0xf]  ;;  %v3010_v10 = vld [vmem:[%s4098_s6 + $0x4d0] sm:$0xf0]  ;;  %v3413_v12 = vor.u32 %v3680_v2, %v3410_v3 }
  0x87   : > { %1939 = vmatpush.bf16.msra.mxu0 %v2421_v44  ;;  %1952 = vmatpush.bf16.msra.mxu1 %v2549_v47  ;;  %v3612_v11 = vld [vmem:[%s4098_s6 + $0x5c4] sm:$0xf]  ;;  %v3138_v13 = vld [vmem:[%s4098_s6 + $0x5d0] sm:$0xf0]  ;;  %v3013_v20 = vor.u32 %v3580_v8, %v3010_v10 }
  0x88   : > { %1965 = vmatpush.bf16.msra.mxu2 %v2677_v48  ;;  %v3644_v14 = vld [vmem:[%s4098_s6 + $0x6c4] sm:$0xf]  ;;  %v3266_v15 = vld [vmem:[%s4098_s6 + $0x6d0] sm:$0xf0]  ;;  %v3141_v21 = vor.u32 %v3612_v11, %v3138_v13 }
  0x89   : > { %1978 = vmatpush.bf16.msra.mxu3 %v2805_v52  ;;  %v3676_v18 = vld [vmem:[%s4098_s6 + $0x7c4] sm:$0xf]  ;;  %v3394_v19 = vld [vmem:[%s4098_s6 + $0x7d0] sm:$0xf0]  ;;  %v3269_v22 = vor.u32 %v3644_v14, %v3266_v15 }
  0x8a   : > { %v3576_v23 = vld [vmem:[%s4098_s6 + $0x4a4] sm:$0xf]  ;;  %v2994_v24 = vld [vmem:[%s4098_s6 + $0x4b0] sm:$0xf0]  ;;  %v3397_v26 = vor.u32 %v3676_v18, %v3394_v19 }
  0x8b   : > { %1940 = vmatpush.bf16.msra.mxu0 %v2405_v59  ;;  %1953 = vmatpush.bf16.msra.mxu1 %v2533_v0  ;;  %v3608_v25 = vld [vmem:[%s4098_s6 + $0x5a4] sm:$0xf]  ;;  %v3122_v27 = vld [vmem:[%s4098_s6 + $0x5b0] sm:$0xf0]  ;;  %v2997_v32 = vor.u32 %v3576_v23, %v2994_v24 }
  0x8c   : > { %1966 = vmatpush.bf16.msra.mxu2 %v2661_v1  ;;  %v3640_v28 = vld [vmem:[%s4098_s6 + $0x6a4] sm:$0xf]  ;;  %v3250_v29 = vld [vmem:[%s4098_s6 + $0x6b0] sm:$0xf0]  ;;  %v3125_v33 = vor.u32 %v3608_v25, %v3122_v27 }
  0x8d   : > { %1979 = vmatpush.bf16.msra.mxu3 %v2789_v4  ;;  %v3672_v30 = vld [vmem:[%s4098_s6 + $0x7a4] sm:$0xf]  ;;  %v3378_v31 = vld [vmem:[%s4098_s6 + $0x7b0] sm:$0xf0]  ;;  %v3253_v35 = vor.u32 %v3640_v28, %v3250_v29 }
  0x8e   : > { %1941 = vmatmul.bf16.vlgmr.msra.gmra.mxu0 %v4198_v9  ;;  %1954 = vmatmul.bf16.vlgmr.msra.gmra.mxu1 %v4205_v17  ;;  %v3572_v36 = vld [vmem:[%s4098_s6 + $0x484] sm:$0xf]  ;;  %v2978_v39 = vld [vmem:[%s4098_s6 + $0x490] sm:$0xf0]  ;;  %v3381_v42 = vor.u32 %v3672_v30, %v3378_v31 }
  0x8f   : > { %1985 = vmatpush.bf16.msrb.mxu0 %v3029_v5  ;;  %1998 = vmatpush.bf16.msrb.mxu1 %v3157_v6  ;;  %v3604_v41 = vld [vmem:[%s4098_s6 + $0x584] sm:$0xf]  ;;  %v3106_v43 = vld [vmem:[%s4098_s6 + $0x590] sm:$0xf0]  ;;  %v2981_v48 = vor.u32 %v3572_v36, %v2978_v39  ;;  %v2520_v39 = vld [vmem:[%s4098_s6 + $0xe8] sm:$0xf] }
  0x90   : > { %2011 = vmatpush.bf16.msrb.mxu2 %v3285_v7  ;;  %1980 = vmatmul.bf16.vlgmr.msra.gmra.mxu3 %v4203_v16  ;;  %v3636_v44 = vld [vmem:[%s4098_s6 + $0x684] sm:$0xf]  ;;  %v3234_v45 = vld [vmem:[%s4098_s6 + $0x690] sm:$0xf0]  ;;  %v3109_v49 = vor.u32 %v3604_v41, %v3106_v43  ;;  %v3459_v41 = vld [vmem:[%s4098_s6 + $0xf4] sm:$0xf0] }
  0x91   : > { %2024 = vmatpush.bf16.msrb.mxu3 %v3413_v12  ;;  %1967 = vmatmul.bf16.vlgmr.msra.gmra.mxu2 %v4190_v63  ;;  %v3668_v46 = vld [vmem:[%s4098_s6 + $0x784] sm:$0xf]  ;;  %v3362_v47 = vld [vmem:[%s4098_s6 + $0x790] sm:$0xf0]  ;;  %v3237_v50 = vor.u32 %v3636_v44, %v3234_v45  ;;  %v3491_v44 = vld [vmem:[%s4098_s6 + $0x1f4] sm:$0xf0] }
  0x92   : > { %v3568_v51 = vld [vmem:[%s4098_s6 + $0x464] sm:$0xf]  ;;  %v2962_v52 = vld [vmem:[%s4098_s6 + $0x470] sm:$0xf0]  ;;  %v3365_v54 = vor.u32 %v3668_v46, %v3362_v47  ;;  %v2776_v45 = vld [vmem:[%s4098_s6 + $0x2e8] sm:$0xf] }
  0x93   : > { %1986 = vmatpush.bf16.msrb.mxu0 %v3013_v20  ;;  %1999 = vmatpush.bf16.msrb.mxu1 %v3141_v21  ;;  %v3600_v53 = vld [vmem:[%s4098_s6 + $0x564] sm:$0xf]  ;;  %v3090_v55 = vld [vmem:[%s4098_s6 + $0x570] sm:$0xf0]  ;;  %v2965_v60 = vor.u32 %v3568_v51, %v2962_v52  ;;  %v3523_v46 = vld [vmem:[%s4098_s6 + $0x2f4] sm:$0xf0]  ;;  %v2521_v52 = vor.u32 %v3459_v41, %v2520_v39 }
  0x94   : > { %2012 = vmatpush.bf16.msrb.mxu2 %v3269_v22  ;;  %v3632_v56 = vld [vmem:[%s4098_s6 + $0x664] sm:$0xf]  ;;  %v3218_v57 = vld [vmem:[%s4098_s6 + $0x670] sm:$0xf0]  ;;  %v3093_v61 = vor.u32 %v3600_v53, %v3090_v55  ;;  %v2504_v55 = vld [vmem:[%s4098_s6 + $0xc8] sm:$0xf] }
  0x95   : > { %2025 = vmatpush.bf16.msrb.mxu3 %v3397_v26  ;;  %v3664_v58 = vld [vmem:[%s4098_s6 + $0x764] sm:$0xf]  ;;  %v3346_v59 = vld [vmem:[%s4098_s6 + $0x770] sm:$0xf0]  ;;  %v3221_v62 = vor.u32 %v3632_v56, %v3218_v57  ;;  %v3455_v56 = vld [vmem:[%s4098_s6 + $0xd4] sm:$0xf0] }
  0x96   : > { %v3564_v0 = vld [vmem:[%s4098_s6 + $0x444] sm:$0xf]  ;;  %v2946_v1 = vld [vmem:[%s4098_s6 + $0x450] sm:$0xf0]  ;;  %v3349_v3 = vor.u32 %v3664_v58, %v3346_v59  ;;  %v2632_v57 = vld [vmem:[%s4098_s6 + $0x1c8] sm:$0xf] }
  0x97   : > { %1987 = vmatpush.bf16.msrb.mxu0 %v2997_v32  ;;  %2000 = vmatpush.bf16.msrb.mxu1 %v3125_v33  ;;  %v3596_v2 = vld [vmem:[%s4098_s6 + $0x544] sm:$0xf]  ;;  %v3074_v4 = vld [vmem:[%s4098_s6 + $0x550] sm:$0xf0]  ;;  %v2949_v10 = vor.u32 %v3564_v0, %v2946_v1  ;;  %v3487_v59 = vld [vmem:[%s4098_s6 + $0x1d4] sm:$0xf0]  ;;  %v2505_v1 = vor.u32 %v3455_v56, %v2504_v55 }
  0x98   : > { %2013 = vmatpush.bf16.msrb.mxu2 %v3253_v35  ;;  %v3628_v5 = vld [vmem:[%s4098_s6 + $0x644] sm:$0xf]  ;;  %v3202_v6 = vld [vmem:[%s4098_s6 + $0x650] sm:$0xf0]  ;;  %v3077_v11 = vor.u32 %v3596_v2, %v3074_v4  ;;  %v3551_v0 = vld [vmem:[%s4098_s6 + $0x3d4] sm:$0xf0]  ;;  %v2633_v2 = vor.u32 %v3487_v59, %v2632_v57 }
  0x99   : > { %2026 = vmatpush.bf16.msrb.mxu3 %v3381_v42  ;;  %v3660_v7 = vld [vmem:[%s4098_s6 + $0x744] sm:$0xf]  ;;  %v3330_v8 = vld [vmem:[%s4098_s6 + $0x750] sm:$0xf0]  ;;  %v3205_v12 = vor.u32 %v3628_v5, %v3202_v6  ;;  %v2648_v42 = vld [vmem:[%s4098_s6 + $0x1e8] sm:$0xf] }
  0x9a   : > { %v3560_v13 = vld [vmem:[%s4098_s6 + $0x424] sm:$0xf]  ;;  %v2930_v14 = vld [vmem:[%s4098_s6 + $0x430] sm:$0xf0]  ;;  %v3333_v18 = vor.u32 %v3660_v7, %v3330_v8  ;;  %v2649_v53 = vor.u32 %v3491_v44, %v2648_v42  ;;  %v2488_v4 = vld [vmem:[%s4098_s6 + $0xa8] sm:$0xf] }
  0x9b   : > { %1988 = vmatpush.bf16.msrb.mxu0 %v2981_v48  ;;  %2001 = vmatpush.bf16.msrb.mxu1 %v3109_v49  ;;  %v3592_v15 = vld [vmem:[%s4098_s6 + $0x524] sm:$0xf]  ;;  %v3058_v19 = vld [vmem:[%s4098_s6 + $0x530] sm:$0xf0]  ;;  %v2933_v24 = vor.u32 %v3560_v13, %v2930_v14  ;;  %v2904_v49 = vld [vmem:[%s4098_s6 + $0x3e8] sm:$0xf] }
  0x9c   : > { %2014 = vmatpush.bf16.msrb.mxu2 %v3237_v50  ;;  %v3624_v20 = vld [vmem:[%s4098_s6 + $0x624] sm:$0xf]  ;;  %v3186_v21 = vld [vmem:[%s4098_s6 + $0x630] sm:$0xf0]  ;;  %v3061_v27 = vor.u32 %v3592_v15, %v3058_v19  ;;  %v3555_v50 = vld [vmem:[%s4098_s6 + $0x3f4] sm:$0xf0] }
  0x9d   : > { %2027 = vmatpush.bf16.msrb.mxu3 %v3365_v54  ;;  %v3656_v22 = vld [vmem:[%s4098_s6 + $0x724] sm:$0xf]  ;;  %v3314_v23 = vld [vmem:[%s4098_s6 + $0x730] sm:$0xf0]  ;;  %v3189_v28 = vor.u32 %v3624_v20, %v3186_v21  ;;  %v2777_v54 = vor.u32 %v3523_v46, %v2776_v45  ;;  %v2905_v58 = vor.u32 %v3555_v50, %v2904_v49  ;;  %v3451_v5 = vld [vmem:[%s4098_s6 + $0xb4] sm:$0xf0] }
  0x9e   : > { %v3556_v25 = vld [vmem:[%s4098_s6 + $0x404] sm:$0xf]  ;;  %v2914_v26 = vld [vmem:[%s4098_s6 + $0x410] sm:$0xf0]  ;;  %v3317_v32 = vor.u32 %v3656_v22, %v3314_v23  ;;  %v2616_v6 = vld [vmem:[%s4098_s6 + $0x1a8] sm:$0xf]  ;;  %v2489_v14 = vor.u32 %v3451_v5, %v2488_v4 }
  0x9f   : > { %1989 = vmatpush.bf16.msrb.mxu0 %v2965_v60  ;;  %2002 = vmatpush.bf16.msrb.mxu1 %v3093_v61  ;;  %v3588_v29 = vld [vmem:[%s4098_s6 + $0x504] sm:$0xf]  ;;  %v3042_v30 = vld [vmem:[%s4098_s6 + $0x510] sm:$0xf0]  ;;  %v2917_v43 = vor.u32 %v3556_v25, %v2914_v26  ;;  %v2760_v60 = vld [vmem:[%s4098_s6 + $0x2c8] sm:$0xf] }
  0xa0   : > { %2015 = vmatpush.bf16.msrb.mxu2 %v3221_v62  ;;  %v3620_v31 = vld [vmem:[%s4098_s6 + $0x604] sm:$0xf]  ;;  %v3170_v33 = vld [vmem:[%s4098_s6 + $0x610] sm:$0xf0]  ;;  %v3045_v47 = vor.u32 %v3588_v29, %v3042_v30  ;;  %v3519_v61 = vld [vmem:[%s4098_s6 + $0x2d4] sm:$0xf0] }
  0xa1   : > { %2028 = vmatpush.bf16.msrb.mxu3 %v3349_v3  ;;  %v3652_v35 = vld [vmem:[%s4098_s6 + $0x704] sm:$0xf]  ;;  %v3298_v36 = vld [vmem:[%s4098_s6 + $0x710] sm:$0xf0]  ;;  %v3173_v48 = vor.u32 %v3620_v31, %v3170_v33  ;;  %v2888_v62 = vld [vmem:[%s4098_s6 + $0x3c8] sm:$0xf]  ;;  %v2761_v3 = vor.u32 %v3519_v61, %v2760_v60 }
  0xa2   : > { %v3301_v51 = vor.u32 %v3652_v35, %v3298_v36  ;;  %v2889_v7 = vor.u32 %v3551_v0, %v2888_v62  ;;  %v3483_v8 = vld [vmem:[%s4098_s6 + $0x1b4] sm:$0xf0]  ;;  %v2472_v19 = vld [vmem:[%s4098_s6 + $0x88] sm:$0xf] }
  0xa3   : > { %1990 = vmatpush.bf16.msrb.mxu0 %v2949_v10  ;;  %2003 = vmatpush.bf16.msrb.mxu1 %v3077_v11  ;;  %v2744_v10 = vld [vmem:[%s4098_s6 + $0x2a8] sm:$0xf]  ;;  %v3515_v11 = vld [vmem:[%s4098_s6 + $0x2b4] sm:$0xf0]  ;;  %v2617_v15 = vor.u32 %v3483_v8, %v2616_v6 }
  0xa4   : > { %2016 = vmatpush.bf16.msrb.mxu2 %v3205_v12  ;;  %v2872_v12 = vld [vmem:[%s4098_s6 + $0x3a8] sm:$0xf]  ;;  %v3547_v13 = vld [vmem:[%s4098_s6 + $0x3b4] sm:$0xf0] }
  0xa5   : > { %2029 = vmatpush.bf16.msrb.mxu3 %v3333_v18  ;;  %v2745_v18 = vor.u32 %v3515_v11, %v2744_v10  ;;  %v3447_v20 = vld [vmem:[%s4098_s6 + $0x94] sm:$0xf0]  ;;  %v2600_v21 = vld [vmem:[%s4098_s6 + $0x188] sm:$0xf]  ;;  %v2873_v22 = vor.u32 %v3547_v13, %v2872_v12 }
  0xa6   : > { %v3479_v23 = vld [vmem:[%s4098_s6 + $0x194] sm:$0xf0]  ;;  %v2856_v26 = vld [vmem:[%s4098_s6 + $0x388] sm:$0xf] }
  0xa7   : > { %1991 = vmatpush.bf16.msrb.mxu0 %v2933_v24  ;;  %2004 = vmatpush.bf16.msrb.mxu1 %v3061_v27  ;;  %v2728_v24 = vld [vmem:[%s4098_s6 + $0x288] sm:$0xf]  ;;  %v3511_v25 = vld [vmem:[%s4098_s6 + $0x294] sm:$0xf0]  ;;  %v2601_v29 = vor.u32 %v3479_v23, %v2600_v21 }
  0xa8   : > { %2017 = vmatpush.bf16.msrb.mxu2 %v3189_v28  ;;  %v3543_v27 = vld [vmem:[%s4098_s6 + $0x394] sm:$0xf0]  ;;  %v2473_v28 = vor.u32 %v3447_v20, %v2472_v19  ;;  %v2729_v30 = vor.u32 %v3511_v25, %v2728_v24  ;;  %v2456_v31 = vld [vmem:[%s4098_s6 + $0x68] sm:$0xf] }
  0xa9   : > { %2030 = vmatpush.bf16.msrb.mxu3 %v3317_v32  ;;  %v3443_v32 = vld [vmem:[%s4098_s6 + $0x74] sm:$0xf0]  ;;  %v2584_v33 = vld [vmem:[%s4098_s6 + $0x168] sm:$0xf]  ;;  %v2857_v35 = vor.u32 %v3543_v27, %v2856_v26 }
  0xaa   : > { %v3475_v36 = vld [vmem:[%s4098_s6 + $0x174] sm:$0xf0]  ;;  %v2712_v39 = vld [vmem:[%s4098_s6 + $0x268] sm:$0xf]  ;;  %v2457_v44 = vor.u32 %v3443_v32, %v2456_v31 }
  0xab   : > { %1992 = vmatpush.bf16.msrb.mxu0 %v2917_v43  ;;  %2005 = vmatpush.bf16.msrb.mxu1 %v3045_v47  ;;  %v3507_v41 = vld [vmem:[%s4098_s6 + $0x274] sm:$0xf0]  ;;  %v2840_v42 = vld [vmem:[%s4098_s6 + $0x368] sm:$0xf]  ;;  %v2585_v45 = vor.u32 %v3475_v36, %v2584_v33 }
  0xac   : > { %2018 = vmatpush.bf16.msrb.mxu2 %v3173_v48  ;;  %v3539_v43 = vld [vmem:[%s4098_s6 + $0x374] sm:$0xf0]  ;;  %v2713_v46 = vor.u32 %v3507_v41, %v2712_v39  ;;  %v2440_v47 = vld [vmem:[%s4098_s6 + $0x48] sm:$0xf] }
  0xad   : > { %2031 = vmatpush.bf16.msrb.mxu3 %v3301_v51  ;;  %v3439_v48 = vld [vmem:[%s4098_s6 + $0x54] sm:$0xf0]  ;;  %v2568_v49 = vld [vmem:[%s4098_s6 + $0x148] sm:$0xf]  ;;  %v2841_v50 = vor.u32 %v3539_v43, %v2840_v42 }
  0xae   : > { %1993 = vmatmul.bf16.vlgmr.msrb.gmra.mxu0 %v4262_v37  ;;  %2006 = vmatmul.bf16.vlgmr.msrb.gmra.mxu1 %v4266_v40  ;;  %v3471_v51 = vld [vmem:[%s4098_s6 + $0x154] sm:$0xf0]  ;;  %v2441_v56 = vor.u32 %v3439_v48, %v2440_v47  ;;  %v2424_v59 = vld [vmem:[%s4098_s6 + $0x28] sm:$0xf] }
  0xaf   : > { %2037 = vmatpush.bf16.msra.mxu0 %v2521_v52  ;;  %2050 = vmatpush.bf16.msra.mxu1 %v2649_v53  ;;  %v2696_v52 = vld [vmem:[%s4098_s6 + $0x248] sm:$0xf]  ;;  %v3503_v53 = vld [vmem:[%s4098_s6 + $0x254] sm:$0xf0]  ;;  %v2569_v57 = vor.u32 %v3471_v51, %v2568_v49 }
  0xb0   : > { %2063 = vmatpush.bf16.msra.mxu2 %v2777_v54  ;;  %2032 = vmatmul.bf16.vlgmr.msrb.gmra.mxu3 %v4264_v38  ;;  %v2824_v54 = vld [vmem:[%s4098_s6 + $0x348] sm:$0xf]  ;;  %v3535_v55 = vld [vmem:[%s4098_s6 + $0x354] sm:$0xf0] }
  0xb1   : > { %2076 = vmatpush.bf16.msra.mxu3 %v2905_v58  ;;  %2019 = vmatmul.bf16.vlgmr.msrb.gmra.mxu2 %v4258_v34  ;;  %v2697_v58 = vor.u32 %v3503_v53, %v2696_v52  ;;  %v3435_v60 = vld [vmem:[%s4098_s6 + $0x34] sm:$0xf0]  ;;  %v2552_v61 = vld [vmem:[%s4098_s6 + $0x128] sm:$0xf]  ;;  %v2825_v62 = vor.u32 %v3535_v55, %v2824_v54 }
  0xb2   : > { %v3467_v0 = vld [vmem:[%s4098_s6 + $0x134] sm:$0xf0]  ;;  %v2425_v5 = vor.u32 %v3435_v60, %v2424_v59  ;;  %v2408_v6 = vld [vmem:[%s4098_s6 + $0x8] sm:$0xf] }
  0xb3   : > { %2038 = vmatpush.bf16.msra.mxu0 %v2505_v1  ;;  %2051 = vmatpush.bf16.msra.mxu1 %v2633_v2  ;;  %v2680_v1 = vld [vmem:[%s4098_s6 + $0x228] sm:$0xf]  ;;  %v3499_v2 = vld [vmem:[%s4098_s6 + $0x234] sm:$0xf0]  ;;  %v2553_v8 = vor.u32 %v3467_v0, %v2552_v61 }
  0xb4   : > { %2064 = vmatpush.bf16.msra.mxu2 %v2761_v3  ;;  %v2808_v3 = vld [vmem:[%s4098_s6 + $0x328] sm:$0xf]  ;;  %v3531_v4 = vld [vmem:[%s4098_s6 + $0x334] sm:$0xf0]  ;;  %v2681_v10 = vor.u32 %v3499_v2, %v2680_v1 }
  0xb5   : > { %2077 = vmatpush.bf16.msra.mxu3 %v2889_v7  ;;  %v3431_v7 = vld [vmem:[%s4098_s6 + $0x14] sm:$0xf0]  ;;  %v2536_v11 = vld [vmem:[%s4098_s6 + $0x108] sm:$0xf] }
  0xb6   : > { %v3463_v12 = vld [vmem:[%s4098_s6 + $0x114] sm:$0xf0]  ;;  %v2664_v13 = vld [vmem:[%s4098_s6 + $0x208] sm:$0xf]  ;;  %v2409_v23 = vor.u32 %v3431_v7, %v2408_v6 }
  0xb7   : > { %2039 = vmatpush.bf16.msra.mxu0 %v2489_v14  ;;  %2052 = vmatpush.bf16.msra.mxu1 %v2617_v15  ;;  %v2809_v14 = vor.u32 %v3531_v4, %v2808_v3  ;;  %v3495_v15 = vld [vmem:[%s4098_s6 + $0x214] sm:$0xf0]  ;;  %v3032_v20 = vld [vmem:[%s4098_s6 + $0x4e8] sm:$0xf]  ;;  %v2537_v27 = vor.u32 %v3463_v12, %v2536_v11 }
  0xb8   : > { %2065 = vmatpush.bf16.msra.mxu2 %v2745_v18  ;;  %v2792_v18 = vld [vmem:[%s4098_s6 + $0x308] sm:$0xf]  ;;  %v3527_v19 = vld [vmem:[%s4098_s6 + $0x314] sm:$0xf0] }
  0xb9   : > { %2078 = vmatpush.bf16.msra.mxu3 %v2873_v22  ;;  %v3587_v21 = vld [vmem:[%s4098_s6 + $0x4f4] sm:$0xf0]  ;;  %v3160_v22 = vld [vmem:[%s4098_s6 + $0x5e8] sm:$0xf]  ;;  %v2793_v31 = vor.u32 %v3527_v19, %v2792_v18 }
  0xba   : > { %v3619_v24 = vld [vmem:[%s4098_s6 + $0x5f4] sm:$0xf0]  ;;  %v3288_v25 = vld [vmem:[%s4098_s6 + $0x6e8] sm:$0xf]  ;;  %v3033_v32 = vor.u32 %v3587_v21, %v3032_v20 }
  0xbb   : > { %2040 = vmatpush.bf16.msra.mxu0 %v2473_v28  ;;  %2053 = vmatpush.bf16.msra.mxu1 %v2601_v29  ;;  %v3651_v26 = vld [vmem:[%s4098_s6 + $0x6f4] sm:$0xf0]  ;;  %v2665_v28 = vor.u32 %v3495_v15, %v2664_v13  ;;  %v3416_v29 = vld [vmem:[%s4098_s6 + $0x7e8] sm:$0xf]  ;;  %v3161_v33 = vor.u32 %v3619_v24, %v3160_v22 }
  0xbc   : > { %2066 = vmatpush.bf16.msra.mxu2 %v2729_v30  ;;  %v3683_v30 = vld [vmem:[%s4098_s6 + $0x7f4] sm:$0xf0]  ;;  %v3016_v36 = vld [vmem:[%s4098_s6 + $0x4c8] sm:$0xf] }
  0xbd   : > { %2079 = vmatpush.bf16.msra.mxu3 %v2857_v35  ;;  %v3289_v35 = vor.u32 %v3651_v26, %v3288_v25  ;;  %v3583_v39 = vld [vmem:[%s4098_s6 + $0x4d4] sm:$0xf0]  ;;  %v3144_v41 = vld [vmem:[%s4098_s6 + $0x5c8] sm:$0xf]  ;;  %v3417_v42 = vor.u32 %v3683_v30, %v3416_v29 }
  0xbe   : > { %v3615_v43 = vld [vmem:[%s4098_s6 + $0x5d4] sm:$0xf0]  ;;  %v3017_v48 = vor.u32 %v3583_v39, %v3016_v36  ;;  %v3000_v51 = vld [vmem:[%s4098_s6 + $0x4a8] sm:$0xf] }
  0xbf   : > { %2041 = vmatpush.bf16.msra.mxu0 %v2457_v44  ;;  %2054 = vmatpush.bf16.msra.mxu1 %v2585_v45  ;;  %v3272_v44 = vld [vmem:[%s4098_s6 + $0x6c8] sm:$0xf]  ;;  %v3647_v45 = vld [vmem:[%s4098_s6 + $0x6d4] sm:$0xf0]  ;;  %v3145_v49 = vor.u32 %v3615_v43, %v3144_v41 }
  0xc0   : > { %2067 = vmatpush.bf16.msra.mxu2 %v2713_v46  ;;  %v3400_v46 = vld [vmem:[%s4098_s6 + $0x7c8] sm:$0xf]  ;;  %v3679_v47 = vld [vmem:[%s4098_s6 + $0x7d4] sm:$0xf0] }
  0xc1   : > { %2080 = vmatpush.bf16.msra.mxu3 %v2841_v50  ;;  %v3273_v50 = vor.u32 %v3647_v45, %v3272_v44  ;;  %v3579_v52 = vld [vmem:[%s4098_s6 + $0x4b4] sm:$0xf0]  ;;  %v3128_v53 = vld [vmem:[%s4098_s6 + $0x5a8] sm:$0xf]  ;;  %v3401_v54 = vor.u32 %v3679_v47, %v3400_v46  ;;  %v4513_v44 = vld [vmem:[%s235_s11] sm:$0xf] }
  0xc2   : > { %v3611_v55 = vld [vmem:[%s4098_s6 + $0x5b4] sm:$0xf0]  ;;  %v3001_v60 = vor.u32 %v3579_v52, %v3000_v51  ;;  %v2984_v0 = vld [vmem:[%s4098_s6 + $0x488] sm:$0xf] }
  0xc3   : > { %2042 = vmatpush.bf16.msra.mxu0 %v2441_v56  ;;  %2055 = vmatpush.bf16.msra.mxu1 %v2569_v57  ;;  %v3256_v56 = vld [vmem:[%s4098_s6 + $0x6a8] sm:$0xf]  ;;  %v3643_v57 = vld [vmem:[%s4098_s6 + $0x6b4] sm:$0xf0]  ;;  %v3129_v61 = vor.u32 %v3611_v55, %v3128_v53 }
  0xc4   : > { %2068 = vmatpush.bf16.msra.mxu2 %v2697_v58  ;;  %v3384_v58 = vld [vmem:[%s4098_s6 + $0x7a8] sm:$0xf]  ;;  %v3675_v59 = vld [vmem:[%s4098_s6 + $0x7b4] sm:$0xf0] }
  0xc5   : > { %2081 = vmatpush.bf16.msra.mxu3 %v2825_v62  ;;  %v3257_v62 = vor.u32 %v3643_v57, %v3256_v56  ;;  %v3575_v1 = vld [vmem:[%s4098_s6 + $0x494] sm:$0xf0]  ;;  %v3112_v2 = vld [vmem:[%s4098_s6 + $0x588] sm:$0xf]  ;;  %v3385_v3 = vor.u32 %v3675_v59, %v3384_v58  ;;  %v541_v56 = vperm.slane %v4513_v44, 0 }
  0xc6   : > { %v3607_v4 = vld [vmem:[%s4098_s6 + $0x594] sm:$0xf0]  ;;  %v3368_v7 = vld [vmem:[%s4098_s6 + $0x788] sm:$0xf] }
  0xc7   : > { %2043 = vmatpush.bf16.msra.mxu0 %v2425_v5  ;;  %2056 = vmatpush.bf16.msra.mxu1 %v2553_v8  ;;  %v3240_v5 = vld [vmem:[%s4098_s6 + $0x688] sm:$0xf]  ;;  %v3639_v6 = vld [vmem:[%s4098_s6 + $0x694] sm:$0xf0]  ;;  %v3113_v11 = vor.u32 %v3607_v4, %v3112_v2 }
  0xc8   : > { %2069 = vmatpush.bf16.msra.mxu2 %v2681_v10  ;;  %v3671_v8 = vld [vmem:[%s4098_s6 + $0x794] sm:$0xf0]  ;;  %v2985_v10 = vor.u32 %v3575_v1, %v2984_v0  ;;  %v3241_v12 = vor.u32 %v3639_v6, %v3240_v5  ;;  %v2968_v13 = vld [vmem:[%s4098_s6 + $0x468] sm:$0xf] }
  0xc9   : > { %2082 = vmatpush.bf16.msra.mxu3 %v2809_v14  ;;  %v3571_v14 = vld [vmem:[%s4098_s6 + $0x474] sm:$0xf0]  ;;  %v3096_v15 = vld [vmem:[%s4098_s6 + $0x568] sm:$0xf]  ;;  %v3369_v18 = vor.u32 %v3671_v8, %v3368_v7  ;;  %v3457_v8 = vld [vmem:[%s4098_s6 + $0xec] sm:$0xf] }
  0xca   : > { %v3603_v19 = vld [vmem:[%s4098_s6 + $0x574] sm:$0xf0]  ;;  %v3224_v20 = vld [vmem:[%s4098_s6 + $0x668] sm:$0xf]  ;;  %v2969_v24 = vor.u32 %v3571_v14, %v2968_v13  ;;  %v1851_v41 = vpop.f32.mrf.mxu1 }
  0xcb   : > { %2044 = vmatpush.bf16.msra.mxu0 %v2409_v23  ;;  %2057 = vmatpush.bf16.msra.mxu1 %v2537_v27  ;;  %v3635_v21 = vld [vmem:[%s4098_s6 + $0x674] sm:$0xf0]  ;;  %v3352_v22 = vld [vmem:[%s4098_s6 + $0x768] sm:$0xf]  ;;  %v3097_v26 = vor.u32 %v3603_v19, %v3096_v15  ;;  %v3521_v19 = vld [vmem:[%s4098_s6 + $0x2ec] sm:$0xf] }
  0xcc   : > { %2070 = vmatpush.bf16.msra.mxu2 %v2665_v28  ;;  %v3667_v23 = vld [vmem:[%s4098_s6 + $0x774] sm:$0xf0]  ;;  %v3225_v27 = vor.u32 %v3635_v21, %v3224_v20  ;;  %v2952_v28 = vld [vmem:[%s4098_s6 + $0x448] sm:$0xf]  ;;  %v2778_v20 = vld [vmem:[%s4098_s6 + $0x2f8] sm:$0xf0] }
  0xcd   : > { %2083 = vmatpush.bf16.msra.mxu3 %v2793_v31  ;;  %v3567_v29 = vld [vmem:[%s4098_s6 + $0x454] sm:$0xf0]  ;;  %v3080_v30 = vld [vmem:[%s4098_s6 + $0x548] sm:$0xf]  ;;  %v3353_v31 = vor.u32 %v3667_v23, %v3352_v22  ;;  %v3553_v23 = vld [vmem:[%s4098_s6 + $0x3ec] sm:$0xf] }
  0xce   : > { %2045 = vmatmul.bf16.vlgmr.msra.gmra.mxu0 %v4198_v9  ;;  %2058 = vmatmul.bf16.vlgmr.msra.gmra.mxu1 %v4205_v17  ;;  %v3336_v36 = vld [vmem:[%s4098_s6 + $0x748] sm:$0xf]  ;;  %v3663_v39 = vld [vmem:[%s4098_s6 + $0x754] sm:$0xf0]  ;;  %v2953_v43 = vor.u32 %v3567_v29, %v2952_v28  ;;  %v2781_v28 = vor.u32 %v3521_v19, %v2778_v20 }
  0xcf   : > { %2089 = vmatpush.bf16.msrb.mxu0 %v3033_v32  ;;  %2102 = vmatpush.bf16.msrb.mxu1 %v3161_v33  ;;  %v3599_v32 = vld [vmem:[%s4098_s6 + $0x554] sm:$0xf0]  ;;  %v3208_v33 = vld [vmem:[%s4098_s6 + $0x648] sm:$0xf] }
  0xd0   : > { %2115 = vmatpush.bf16.msrb.mxu2 %v3289_v35  ;;  %2084 = vmatmul.bf16.vlgmr.msra.gmra.mxu3 %v4203_v16  ;;  %v3631_v35 = vld [vmem:[%s4098_s6 + $0x654] sm:$0xf0]  ;;  %v3081_v45 = vor.u32 %v3599_v32, %v3080_v30  ;;  %v2936_v47 = vld [vmem:[%s4098_s6 + $0x428] sm:$0xf]  ;;  %v3453_v30 = vld [vmem:[%s4098_s6 + $0xcc] sm:$0xf] }
  0xd1   : > { %2128 = vmatpush.bf16.msrb.mxu3 %v3417_v42  ;;  %2071 = vmatmul.bf16.vlgmr.msra.gmra.mxu2 %v4190_v63  ;;  %v3209_v46 = vor.u32 %v3631_v35, %v3208_v33  ;;  %v3595_v51 = vld [vmem:[%s4098_s6 + $0x534] sm:$0xf0]  ;;  %v3192_v52 = vld [vmem:[%s4098_s6 + $0x628] sm:$0xf]  ;;  %v3485_v32 = vld [vmem:[%s4098_s6 + $0x1cc] sm:$0xf] }
  0xd2   : > { %v3627_v53 = vld [vmem:[%s4098_s6 + $0x634] sm:$0xf0]  ;;  %v4524_v57 = vpop.f32.mrf.mxu3  ;;  %v2920_v59 = vld [vmem:[%s4098_s6 + $0x408] sm:$0xf]  ;;  %v1853_v13 = vpop.f32.mrf.mxu1 }
  0xd3   : > { %2090 = vmatpush.bf16.msrb.mxu0 %v3017_v48  ;;  %2103 = vmatpush.bf16.msrb.mxu1 %v3145_v49  ;;  %v3563_v48 = vld [vmem:[%s4098_s6 + $0x434] sm:$0xf0]  ;;  %v3064_v49 = vld [vmem:[%s4098_s6 + $0x528] sm:$0xf]  ;;  %v3193_v0 = vor.u32 %v3627_v53, %v3192_v52  ;;  %v3481_v52 = vld [vmem:[%s4098_s6 + $0x1ac] sm:$0xf] }
  0xd4   : > { %2116 = vmatpush.bf16.msrb.mxu2 %v3273_v50  ;;  %v3337_v50 = vor.u32 %v3663_v39, %v3336_v36  ;;  %v3659_v55 = vld [vmem:[%s4098_s6 + $0x734] sm:$0xf0]  ;;  %v2937_v58 = vor.u32 %v3563_v48, %v2936_v47  ;;  %v3048_v1 = vld [vmem:[%s4098_s6 + $0x508] sm:$0xf]  ;;  %v2634_v36 = vld [vmem:[%s4098_s6 + $0x1d8] sm:$0xf0] }
  0xd5   : > { %2129 = vmatpush.bf16.msrb.mxu3 %v3401_v54  ;;  %v3320_v54 = vld [vmem:[%s4098_s6 + $0x728] sm:$0xf]  ;;  %v3591_v2 = vld [vmem:[%s4098_s6 + $0x514] sm:$0xf0]  ;;  %v3517_v39 = vld [vmem:[%s4098_s6 + $0x2cc] sm:$0xf]  ;;  %v2637_v47 = vor.u32 %v3485_v32, %v2634_v36 }
  0xd6   : > { %v3321_v4 = vor.u32 %v3659_v55, %v3320_v54  ;;  %v3623_v5 = vld [vmem:[%s4098_s6 + $0x614] sm:$0xf0]  ;;  %v3304_v6 = vld [vmem:[%s4098_s6 + $0x708] sm:$0xf]  ;;  %v3049_v21 = vor.u32 %v3591_v2, %v3048_v1  ;;  %v2618_v54 = vld [vmem:[%s4098_s6 + $0x1b8] sm:$0xf0] }
  0xd7   : > { %2091 = vmatpush.bf16.msrb.mxu0 %v3001_v60  ;;  %2104 = vmatpush.bf16.msrb.mxu1 %v3129_v61  ;;  %v1838_v25 = vpop.f32.mrf.mxu0  ;;  %v3559_v60 = vld [vmem:[%s4098_s6 + $0x414] sm:$0xf0]  ;;  %v3513_v55 = vld [vmem:[%s4098_s6 + $0x2ac] sm:$0xf]  ;;  %v2474_v1 = vld [vmem:[%s4098_s6 + $0x98] sm:$0xf0] }
  0xd8   : > { %2117 = vmatpush.bf16.msrb.mxu2 %v3257_v62  ;;  %v3065_v62 = vor.u32 %v3595_v51, %v3064_v49  ;;  %v3655_v7 = vld [vmem:[%s4098_s6 + $0x714] sm:$0xf0]  ;;  %v2921_v15 = vor.u32 %v3559_v60, %v2920_v59  ;;  %v2490_v51 = vld [vmem:[%s4098_s6 + $0xb8] sm:$0xf0]  ;;  %v3477_v2 = vld [vmem:[%s4098_s6 + $0x18c] sm:$0xf] }
  0xd9   : > { %2130 = vmatpush.bf16.msrb.mxu3 %v3385_v3  ;;  %v4509_v42 = vpop.f32.mrf.mxu2  ;;  %v3176_v3 = vld [vmem:[%s4098_s6 + $0x608] sm:$0xf]  ;;  %v3441_v13 = vld [vmem:[%s4098_s6 + $0x6c] sm:$0xf]  ;;  %v2570_v36 = vld [vmem:[%s4098_s6 + $0x158] sm:$0xf0] }
  0xda   : > { %v3177_v22 = vor.u32 %v3623_v5, %v3176_v3  ;;  %v1879_v33 = vpop.f32.mrf.mxu3  ;;  %v3509_v5 = vld [vmem:[%s4098_s6 + $0x28c] sm:$0xf] }
  0xdb   : > { %2092 = vmatpush.bf16.msrb.mxu0 %v2985_v10  ;;  %2105 = vmatpush.bf16.msrb.mxu1 %v3113_v11  ;;  %v2522_v10 = vld [vmem:[%s4098_s6 + $0xf8] sm:$0xf0]  ;;  %v3489_v11 = vld [vmem:[%s4098_s6 + $0x1ec] sm:$0xf] }
  0xdc   : > { %2118 = vmatpush.bf16.msrb.mxu2 %v3241_v12  ;;  %v1839_v12 = vadd.f32 %v1838_v25, %v541_v56  ;;  %v3305_v25 = vor.u32 %v3655_v7, %v3304_v6  ;;  %v2746_v56 = vld [vmem:[%s4098_s6 + $0x2b8] sm:$0xf0]  ;;  %v3541_v7 = vld [vmem:[%s4098_s6 + $0x38c] sm:$0xf] }
  0xdd   : > { %2131 = vmatpush.bf16.msrb.mxu3 %v3369_v18  ;;  %v2650_v18 = vld [vmem:[%s4098_s6 + $0x1f8] sm:$0xf0]  ;;  %v3469_v32 = vld [vmem:[%s4098_s6 + $0x14c] sm:$0xf] }
  0xde   : > { %v1852_v29 = vadd.f32 %v1851_v41, %v1839_v12  ;;  %v2730_v6 = vld [vmem:[%s4098_s6 + $0x298] sm:$0xf0] }
  0xdf   : > { %2093 = vmatpush.bf16.msrb.mxu0 %v2969_v24  ;;  %2106 = vmatpush.bf16.msrb.mxu1 %v3097_v26  ;;  %v1840_v61 = vpop.f32.mrf.mxu0  ;;  %v2906_v24 = vld [vmem:[%s4098_s6 + $0x3f8] sm:$0xf0]  ;;  %v2525_v26 = vor.u32 %v3457_v8, %v2522_v10  ;;  %v2733_v12 = vor.u32 %v3509_v5, %v2730_v6  ;;  %v3461_v5 = vld [vmem:[%s4098_s6 + $0x10c] sm:$0xf] }
  0xe0   : > { %2119 = vmatpush.bf16.msrb.mxu2 %v3225_v27  ;;  %v2653_v27 = vor.u32 %v3489_v11, %v2650_v18  ;;  %v2909_v35 = vor.u32 %v3553_v23, %v2906_v24  ;;  %v1865_v49 = vadd.f32 %v4509_v42, %v1852_v29  ;;  %v2874_v42 = vld [vmem:[%s4098_s6 + $0x3b8] sm:$0xf0]  ;;  %v2621_v61 = vor.u32 %v3481_v52, %v2618_v54  ;;  %v3537_v24 = vld [vmem:[%s4098_s6 + $0x36c] sm:$0xf] }
  0xe1   : > { %2132 = vmatpush.bf16.msrb.mxu3 %v3353_v31  ;;  %v1866_v14 = vpop.f32.mrf.mxu2  ;;  %v2506_v31 = vld [vmem:[%s4098_s6 + $0xd8] sm:$0xf0] }
  0xe2   : > { %v2509_v41 = vor.u32 %v3453_v30, %v2506_v31  ;;  %v1878_v60 = vadd.f32 %v4524_v57, %v1865_v49  ;;  %v2858_v8 = vld [vmem:[%s4098_s6 + $0x398] sm:$0xf0]  ;;  %v3437_v30 = vld [vmem:[%s4098_s6 + $0x4c] sm:$0xf] }
  0xe3   : > { %2094 = vmatpush.bf16.msrb.mxu0 %v2953_v43  ;;  %2107 = vmatpush.bf16.msrb.mxu1 %v3081_v45  ;;  %v2762_v43 = vld [vmem:[%s4098_s6 + $0x2d8] sm:$0xf0]  ;;  %v3549_v45 = vld [vmem:[%s4098_s6 + $0x3cc] sm:$0xf]  ;;  %v2861_v20 = vor.u32 %v3541_v7, %v2858_v8 }
  0xe4   : > { %2120 = vmatpush.bf16.msrb.mxu2 %v3209_v46  ;;  %v2890_v46 = vld [vmem:[%s4098_s6 + $0x3d8] sm:$0xf0]  ;;  %v2765_v48 = vor.u32 %v3517_v39, %v2762_v43  ;;  %v3501_v39 = vld [vmem:[%s4098_s6 + $0x24c] sm:$0xf] }
  0xe5   : > { %2133 = vmatpush.bf16.msrb.mxu3 %v3337_v50  ;;  %v3449_v50 = vld [vmem:[%s4098_s6 + $0xac] sm:$0xf]  ;;  %v2893_v53 = vor.u32 %v3549_v45, %v2890_v46  ;;  %v2458_v14 = vld [vmem:[%s4098_s6 + $0x78] sm:$0xf0] }
  0xe6   : > { %v2493_v59 = vor.u32 %v3449_v50, %v2490_v51  ;;  %v2714_v23 = vld [vmem:[%s4098_s6 + $0x278] sm:$0xf0]  ;;  %v2573_v51 = vor.u32 %v3469_v32, %v2570_v36  ;;  %v3493_v7 = vld [vmem:[%s4098_s6 + $0x20c] sm:$0xf] }
  0xe7   : > { %2095 = vmatpush.bf16.msrb.mxu0 %v2937_v58  ;;  %2108 = vmatpush.bf16.msrb.mxu1 %v3065_v62  ;;  %v3545_v58 = vld [vmem:[%s4098_s6 + $0x3ac] sm:$0xf]  ;;  %v2749_v62 = vor.u32 %v3513_v55, %v2746_v56  ;;  %v2442_v31 = vld [vmem:[%s4098_s6 + $0x58] sm:$0xf0] }
  0xe8   : > { %2121 = vmatpush.bf16.msrb.mxu2 %v3193_v0  ;;  %v3445_v0 = vld [vmem:[%s4098_s6 + $0x8c] sm:$0xf]  ;;  %v2877_v3 = vor.u32 %v3545_v58, %v2874_v42  ;;  %v2698_v43 = vld [vmem:[%s4098_s6 + $0x258] sm:$0xf0] }
  0xe9   : > { %2134 = vmatpush.bf16.msrb.mxu3 %v3321_v4  ;;  %v2602_v4 = vld [vmem:[%s4098_s6 + $0x198] sm:$0xf0]  ;;  %v2477_v57 = vor.u32 %v3445_v0, %v2474_v1  ;;  %v2701_v52 = vor.u32 %v3501_v39, %v2698_v43  ;;  %v3465_v55 = vld [vmem:[%s4098_s6 + $0x12c] sm:$0xf] }
  0xea   : > { %v2605_v11 = vor.u32 %v3477_v2, %v2602_v4  ;;  %v2426_v54 = vld [vmem:[%s4098_s6 + $0x38] sm:$0xf0]  ;;  %v3429_v1 = vld [vmem:[%s4098_s6 + $0xc] sm:$0xf] }
  0xeb   : > { %2096 = vmatpush.bf16.msrb.mxu0 %v2921_v15  ;;  %2109 = vmatpush.bf16.msrb.mxu1 %v3049_v21  ;;  %v1890_v10 = vpop.f32.mrf.mxu0  ;;  %v3473_v15 = vld [vmem:[%s4098_s6 + $0x16c] sm:$0xf]  ;;  %v1903_v19 = vpop.f32.mrf.mxu1  ;;  %v2586_v21 = vld [vmem:[%s4098_s6 + $0x178] sm:$0xf0] }
  0xec   : > { %2122 = vmatpush.bf16.msrb.mxu2 %v3177_v22  ;;  %v1891_v18 = vadd.f32 %v1890_v10, %v1878_v60  ;;  %v3505_v22 = vld [vmem:[%s4098_s6 + $0x26c] sm:$0xf]  ;;  %v2554_v42 = vld [vmem:[%s4098_s6 + $0x138] sm:$0xf0] }
  0xed   : > { %2135 = vmatpush.bf16.msrb.mxu3 %v3305_v25  ;;  %v2842_v25 = vld [vmem:[%s4098_s6 + $0x378] sm:$0xf0]  ;;  %v2717_v29 = vor.u32 %v3505_v22, %v2714_v23  ;;  %v3645_v39 = vld [vmem:[%s4098_s6 + $0x6cc] sm:$0xf] }
  0xee   : > { %2097 = vmatmul.bf16.vlgmr.msrb.gmra.mxu0 %v4262_v37  ;;  %2110 = vmatmul.bf16.vlgmr.msrb.gmra.mxu1 %v4266_v40  ;;  %v2682_v60 = vld [vmem:[%s4098_s6 + $0x238] sm:$0xf0] }
  0xef   : > { %2141 = vmatpush.bf16.msra.mxu0 %v2525_v26  ;;  %2154 = vmatpush.bf16.msra.mxu1 %v2653_v27  ;;  %v1904_v26 = vadd.f32 %v1903_v19, %v1891_v18  ;;  %v2461_v27 = vor.u32 %v3441_v13, %v2458_v14  ;;  %v2410_v2 = vld [vmem:[%s4098_s6 + $0x18] sm:$0xf0]  ;;  %v3585_v14 = vld [vmem:[%s4098_s6 + $0x4ec] sm:$0xf] }
  0xf0   : > { %2167 = vmatpush.bf16.msra.mxu2 %v2781_v28  ;;  %2136 = vmatmul.bf16.vlgmr.msrb.gmra.mxu3 %v4264_v38  ;;  %v2589_v28 = vor.u32 %v3473_v15, %v2586_v21  ;;  %v2538_v6 = vld [vmem:[%s4098_s6 + $0x118] sm:$0xf0]  ;;  %v3617_v18 = vld [vmem:[%s4098_s6 + $0x5ec] sm:$0xf]  ;;  %v2413_v19 = vor.u32 %v3429_v1, %v2410_v2 }
  0xf1   : > { %2180 = vmatpush.bf16.msra.mxu3 %v2909_v35  ;;  %2123 = vmatmul.bf16.vlgmr.msrb.gmra.mxu2 %v4258_v34  ;;  %v2845_v35 = vor.u32 %v3537_v24, %v2842_v25  ;;  %v2666_v10 = vld [vmem:[%s4098_s6 + $0x218] sm:$0xf0]  ;;  %v3649_v21 = vld [vmem:[%s4098_s6 + $0x6ec] sm:$0xf]  ;;  %v2541_v23 = vor.u32 %v3461_v5, %v2538_v6 }
  0xf2   : > { %v3034_v15 = vld [vmem:[%s4098_s6 + $0x4f8] sm:$0xf0]  ;;  %v2669_v24 = vor.u32 %v3493_v7, %v2666_v10  ;;  %v3681_v25 = vld [vmem:[%s4098_s6 + $0x7ec] sm:$0xf] }
  0xf3   : > { %2142 = vmatpush.bf16.msra.mxu0 %v2509_v41  ;;  %2155 = vmatpush.bf16.msra.mxu1 %v2637_v47  ;;  %v1929_v46 = vpop.f32.mrf.mxu3  ;;  %v3533_v41 = vld [vmem:[%s4098_s6 + $0x34c] sm:$0xf]  ;;  %v2826_v47 = vld [vmem:[%s4098_s6 + $0x358] sm:$0xf0]  ;;  %v1892_v50 = vpop.f32.mrf.mxu0 }
  0xf4   : > { %2168 = vmatpush.bf16.msra.mxu2 %v2765_v48  ;;  %v1916_v33 = vpop.f32.mrf.mxu2  ;;  %v2445_v48 = vor.u32 %v3437_v30, %v2442_v31  ;;  %v1905_v56 = vpop.f32.mrf.mxu1  ;;  %v2829_v58 = vor.u32 %v3533_v41, %v2826_v47  ;;  %v3290_v22 = vld [vmem:[%s4098_s6 + $0x6f8] sm:$0xf0]  ;;  %v3581_v31 = vld [vmem:[%s4098_s6 + $0x4cc] sm:$0xf] }
  0xf5   : > { %2181 = vmatpush.bf16.msra.mxu3 %v2893_v53  ;;  %v1917_v45 = vadd.f32 %v1916_v33, %v1904_v26  ;;  %v3433_v53 = vld [vmem:[%s4098_s6 + $0x2c] sm:$0xf]  ;;  %v3418_v26 = vld [vmem:[%s4098_s6 + $0x7f8] sm:$0xf0]  ;;  %v3293_v30 = vor.u32 %v3649_v21, %v3290_v22 }
  0xf6   : > { %v2429_v0 = vor.u32 %v3433_v53, %v2426_v54  ;;  %v3018_v32 = vld [vmem:[%s4098_s6 + $0x4d8] sm:$0xf0]  ;;  %v3613_v33 = vld [vmem:[%s4098_s6 + $0x5cc] sm:$0xf] }
  0xf7   : > { %2143 = vmatpush.bf16.msra.mxu0 %v2493_v59  ;;  %2156 = vmatpush.bf16.msra.mxu1 %v2621_v61  ;;  %v1930_v49 = vadd.f32 %v1929_v46, %v1917_v45  ;;  %v3497_v59 = vld [vmem:[%s4098_s6 + $0x22c] sm:$0xf]  ;;  %v3146_v36 = vld [vmem:[%s4098_s6 + $0x5d8] sm:$0xf0]  ;;  %v3021_v41 = vor.u32 %v3581_v31, %v3018_v32 }
  0xf8   : > { %2169 = vmatpush.bf16.msra.mxu2 %v2749_v62  ;;  %v3529_v61 = vld [vmem:[%s4098_s6 + $0x32c] sm:$0xf]  ;;  %v2810_v62 = vld [vmem:[%s4098_s6 + $0x338] sm:$0xf0]  ;;  %v2685_v4 = vor.u32 %v3497_v59, %v2682_v60  ;;  %v3149_v47 = vor.u32 %v3613_v33, %v3146_v36 }
  0xf9   : > { %2182 = vmatpush.bf16.msra.mxu3 %v2877_v3  ;;  %2245 = vst [vmem:[%s4594_s28] sm:$0xff] %v1930_v49  ;;  %v2557_v3 = vor.u32 %v3465_v55, %v2554_v42  ;;  %v3274_v43 = vld [vmem:[%s4098_s6 + $0x6d8] sm:$0xf0]  ;;  %v3677_v45 = vld [vmem:[%s4098_s6 + $0x7cc] sm:$0xf] }
  0xfa   : > { %v3402_v46 = vld [vmem:[%s4098_s6 + $0x7d8] sm:$0xf0]  ;;  %v3577_v49 = vld [vmem:[%s4098_s6 + $0x4ac] sm:$0xf] }
  0xfb   : > { %2144 = vmatpush.bf16.msra.mxu0 %v2477_v57  ;;  %2157 = vmatpush.bf16.msra.mxu1 %v2605_v11  ;;  %v2813_v57 = vor.u32 %v3529_v61, %v2810_v62  ;;  %v3525_v11 = vld [vmem:[%s4098_s6 + $0x30c] sm:$0xf]  ;;  %v1931_v13 = vpop.f32.mrf.mxu3  ;;  %v3002_v50 = vld [vmem:[%s4098_s6 + $0x4b8] sm:$0xf0] }
  0xfc   : > { %2170 = vmatpush.bf16.msra.mxu2 %v2733_v12  ;;  %v1918_v8 = vpop.f32.mrf.mxu2  ;;  %v2794_v12 = vld [vmem:[%s4098_s6 + $0x318] sm:$0xf0]  ;;  %v3641_v54 = vld [vmem:[%s4098_s6 + $0x6ac] sm:$0xf]  ;;  %v3005_v42 = vor.u32 %v3577_v49, %v3002_v50 }
  0xfd   : > { %2183 = vmatpush.bf16.msra.mxu3 %v2861_v20  ;;  %v3162_v20 = vld [vmem:[%s4098_s6 + $0x5f8] sm:$0xf0]  ;;  %v3673_v56 = vld [vmem:[%s4098_s6 + $0x7ac] sm:$0xf] }
  0xfe   : > { %v3130_v53 = vld [vmem:[%s4098_s6 + $0x5b8] sm:$0xf0]  ;;  %v3573_v60 = vld [vmem:[%s4098_s6 + $0x48c] sm:$0xf] }
  0xff   : > { %2145 = vmatpush.bf16.msra.mxu0 %v2461_v27  ;;  %2158 = vmatpush.bf16.msra.mxu1 %v2589_v28  ;;  %v2797_v27 = vor.u32 %v3525_v11, %v2794_v12  ;;  %v3037_v28 = vor.u32 %v3585_v14, %v3034_v15  ;;  %v3258_v55 = vld [vmem:[%s4098_s6 + $0x6b8] sm:$0xf0]  ;;  %v3669_v2 = vld [vmem:[%s4098_s6 + $0x78c] sm:$0xf] }
 0x100   : > { %2171 = vmatpush.bf16.msra.mxu2 %v2717_v29  ;;  %v3165_v29 = vor.u32 %v3617_v18, %v3162_v20  ;;  %v3261_v59 = vor.u32 %v3641_v54, %v3258_v55  ;;  %v2986_v61 = vld [vmem:[%s4098_s6 + $0x498] sm:$0xf0]  ;;  %v3569_v7 = vld [vmem:[%s4098_s6 + $0x46c] sm:$0xf] }
 0x101   : > { %2184 = vmatpush.bf16.msra.mxu3 %v2845_v35  ;;  %v3421_v35 = vor.u32 %v3681_v25, %v3418_v26  ;;  %v3242_v1 = vld [vmem:[%s4098_s6 + $0x698] sm:$0xf0]  ;;  %v3633_v13 = vld [vmem:[%s4098_s6 + $0x66c] sm:$0xf] }
 0x102   : > { %v2970_v8 = vld [vmem:[%s4098_s6 + $0x478] sm:$0xf0]  ;;  %v3665_v15 = vld [vmem:[%s4098_s6 + $0x76c] sm:$0xf] }
 0x103   : > { %2146 = vmatpush.bf16.msra.mxu0 %v2445_v48  ;;  %2159 = vmatpush.bf16.msra.mxu1 %v2573_v51  ;;  %v3277_v48 = vor.u32 %v3645_v39, %v3274_v43  ;;  %v3609_v51 = vld [vmem:[%s4098_s6 + $0x5ac] sm:$0xf]  ;;  %v3098_v12 = vld [vmem:[%s4098_s6 + $0x578] sm:$0xf0] }
 0x104   : > { %2172 = vmatpush.bf16.msra.mxu2 %v2701_v52  ;;  %v3405_v52 = vor.u32 %v3677_v45, %v3402_v46  ;;  %v3226_v14 = vld [vmem:[%s4098_s6 + $0x678] sm:$0xf0]  ;;  %v3565_v22 = vld [vmem:[%s4098_s6 + $0x44c] sm:$0xf] }
 0x105   : > { %2185 = vmatpush.bf16.msra.mxu3 %v2829_v58  ;;  %v3386_v58 = vld [vmem:[%s4098_s6 + $0x7b8] sm:$0xf0]  ;;  %v3229_v21 = vor.u32 %v3633_v13, %v3226_v14  ;;  %v3661_v31 = vld [vmem:[%s4098_s6 + $0x74c] sm:$0xf] }
 0x106   : > { %v3389_v62 = vor.u32 %v3673_v56, %v3386_v58  ;;  %v3354_v18 = vld [vmem:[%s4098_s6 + $0x778] sm:$0xf0]  ;;  %v3561_v43 = vld [vmem:[%s4098_s6 + $0x42c] sm:$0xf] }
 0x107   : > { %2147 = vmatpush.bf16.msra.mxu0 %v2429_v0  ;;  %2160 = vmatpush.bf16.msra.mxu1 %v2557_v3  ;;  %v3114_v0 = vld [vmem:[%s4098_s6 + $0x598] sm:$0xf0]  ;;  %v3357_v26 = vor.u32 %v3665_v15, %v3354_v18  ;;  %v3593_v46 = vld [vmem:[%s4098_s6 + $0x52c] sm:$0xf] }
 0x108   : > { %2173 = vmatpush.bf16.msra.mxu2 %v2685_v4  ;;  %v3370_v3 = vld [vmem:[%s4098_s6 + $0x798] sm:$0xf0]  ;;  %v3625_v49 = vld [vmem:[%s4098_s6 + $0x62c] sm:$0xf] }
 0x109   : > { %2186 = vmatpush.bf16.msra.mxu3 %v2813_v57  ;;  %v3601_v57 = vld [vmem:[%s4098_s6 + $0x56c] sm:$0xf]  ;;  %v3373_v11 = vor.u32 %v3669_v2, %v3370_v3  ;;  %v3338_v32 = vld [vmem:[%s4098_s6 + $0x758] sm:$0xf0] }
 0x10a   : > { %v3101_v20 = vor.u32 %v3601_v57, %v3098_v12  ;;  %v2938_v45 = vld [vmem:[%s4098_s6 + $0x438] sm:$0xf0]  ;;  %v3557_v58 = vld [vmem:[%s4098_s6 + $0x40c] sm:$0xf] }
 0x10b   : > { %2148 = vmatpush.bf16.msra.mxu0 %v2413_v19  ;;  %2161 = vmatpush.bf16.msra.mxu1 %v2541_v23  ;;  %v4646_v4 = vpop.f32.mrf.mxu0  ;;  %v4651_v10 = vpop.f32.mrf.mxu1  ;;  %v2973_v19 = vor.u32 %v3569_v7, %v2970_v8  ;;  %v2954_v23 = vld [vmem:[%s4098_s6 + $0x458] sm:$0xf0]  ;;  %v2941_v54 = vor.u32 %v3561_v43, %v2938_v45 }
 0x10c   : > { %2174 = vmatpush.bf16.msra.mxu2 %v2669_v24  ;;  %v3597_v24 = vld [vmem:[%s4098_s6 + $0x54c] sm:$0xf]  ;;  %v2957_v33 = vor.u32 %v3565_v22, %v2954_v23  ;;  %v3194_v50 = vld [vmem:[%s4098_s6 + $0x638] sm:$0xf0] }
 0x10d   : > { %2187 = vmatpush.bf16.msra.mxu3 %v2797_v27  ;;  %v3082_v27 = vld [vmem:[%s4098_s6 + $0x558] sm:$0xf0]  ;;  %v3197_v56 = vor.u32 %v3625_v49, %v3194_v50 }
 0x10e   : > { %2149 = vmatmul.bf16.vlgmr.msra.gmra.mxu0 %v4198_v9  ;;  %2162 = vmatmul.bf16.vlgmr.msra.gmra.mxu1 %v4205_v17  ;;  %v3637_v9 = vld [vmem:[%s4098_s6 + $0x68c] sm:$0xf]  ;;  %v2989_v17 = vor.u32 %v3573_v60, %v2986_v61  ;;  %v3085_v36 = vor.u32 %v3597_v24, %v3082_v27  ;;  %v3050_v61 = vld [vmem:[%s4098_s6 + $0x518] sm:$0xf0] }
 0x10f   : > { %2193 = vmatpush.bf16.msrb.mxu0 %v3037_v28  ;;  %2206 = vmatpush.bf16.msrb.mxu1 %v3165_v29  ;;  %v3245_v6 = vor.u32 %v3637_v9, %v3242_v1  ;;  %v3629_v28 = vld [vmem:[%s4098_s6 + $0x64c] sm:$0xf]  ;;  %v3210_v29 = vld [vmem:[%s4098_s6 + $0x658] sm:$0xf0] }
 0x110   : > { %2219 = vmatpush.bf16.msrb.mxu2 %v3293_v30  ;;  %2188 = vmatmul.bf16.vlgmr.msra.gmra.mxu3 %v4203_v16  ;;  %v3605_v16 = vld [vmem:[%s4098_s6 + $0x58c] sm:$0xf]  ;;  %v3213_v39 = vor.u32 %v3629_v28, %v3210_v29  ;;  %v3306_v1 = vld [vmem:[%s4098_s6 + $0x718] sm:$0xf0] }
 0x111   : > { %2232 = vmatpush.bf16.msrb.mxu3 %v3421_v35  ;;  %2175 = vmatmul.bf16.vlgmr.msra.gmra.mxu2 %v4190_v63  ;;  %v3133_v63 = vor.u32 %v3609_v51, %v3130_v53  ;;  %v3117_v5 = vor.u32 %v3605_v16, %v3114_v0  ;;  %v3657_v51 = vld [vmem:[%s4098_s6 + $0x72c] sm:$0xf]  ;;  %v542_v53 = vperm.slane %v4513_v44, 1 }
 0x112   : > { %v3621_v16 = vld [vmem:[%s4098_s6 + $0x60c] sm:$0xf] }
 0x113   : > { %2194 = vmatpush.bf16.msrb.mxu0 %v3021_v41  ;;  %2207 = vmatpush.bf16.msrb.mxu1 %v3149_v47  ;;  %v1981_v30 = vpop.f32.mrf.mxu3  ;;  %v1944_v35 = vpop.f32.mrf.mxu0  ;;  %v3341_v47 = vor.u32 %v3661_v31, %v3338_v32  ;;  %v3653_v9 = vld [vmem:[%s4098_s6 + $0x70c] sm:$0xf]  ;;  %v1943_v2 = vadd.f32 %v4646_v4, %v542_v53 }
 0x114   : > { %2220 = vmatpush.bf16.msrb.mxu2 %v3277_v48  ;;  %v1968_v25 = vpop.f32.mrf.mxu2  ;;  %v1957_v41 = vpop.f32.mrf.mxu1  ;;  %v3066_v48 = vld [vmem:[%s4098_s6 + $0x538] sm:$0xf0] }
 0x115   : > { %2233 = vmatpush.bf16.msrb.mxu3 %v3405_v52  ;;  %v3322_v52 = vld [vmem:[%s4098_s6 + $0x738] sm:$0xf0]  ;;  %v3069_v55 = vor.u32 %v3593_v46, %v3066_v48  ;;  %v1956_v7 = vadd.f32 %v4651_v10, %v1943_v2 }
 0x116   : > { %v3325_v60 = vor.u32 %v3657_v51, %v3322_v52 }
 0x117   : > { %2195 = vmatpush.bf16.msrb.mxu0 %v3005_v42  ;;  %2208 = vmatpush.bf16.msrb.mxu1 %v3133_v63  ;;  %v2922_v42 = vld [vmem:[%s4098_s6 + $0x418] sm:$0xf0]  ;;  %v3589_v63 = vld [vmem:[%s4098_s6 + $0x50c] sm:$0xf]  ;;  %v1969_v8 = vadd.f32 %v1968_v25, %v1956_v7  ;;  %v543_v25 = vperm.slane %v4513_v44, 2 }
 0x118   : > { %2221 = vmatpush.bf16.msrb.mxu2 %v3261_v59  ;;  %v2925_v3 = vor.u32 %v3557_v58, %v2922_v42 }
 0x119   : > { %2234 = vmatpush.bf16.msrb.mxu3 %v3389_v62  ;;  %v3178_v62 = vld [vmem:[%s4098_s6 + $0x618] sm:$0xf0]  ;;  %v1982_v4 = vadd.f32 %v1981_v30, %v1969_v8 }
 0x11b   : > { %2196 = vmatpush.bf16.msrb.mxu0 %v2989_v17  ;;  %2209 = vmatpush.bf16.msrb.mxu1 %v3117_v5  ;;  %v1983_v0 = vpop.f32.mrf.mxu3  ;;  %v3053_v17 = vor.u32 %v3589_v63, %v3050_v61  ;;  %v3181_v5 = vor.u32 %v3621_v16, %v3178_v62 }
 0x11c   : > { %2222 = vmatpush.bf16.msrb.mxu2 %v3245_v6  ;;  %v1970_v59 = vpop.f32.mrf.mxu2  ;;  %v3309_v6 = vor.u32 %v3653_v9, %v3306_v1 }
 0x11d   : > { %2235 = vmatpush.bf16.msrb.mxu3 %v3373_v11 }
 0x11f   : > { %2197 = vmatpush.bf16.msrb.mxu0 %v2973_v19  ;;  %2210 = vmatpush.bf16.msrb.mxu1 %v3101_v20 }
 0x120   : > { %2223 = vmatpush.bf16.msrb.mxu2 %v3229_v21 }
 0x121   : > { %2236 = vmatpush.bf16.msrb.mxu3 %v3357_v26 }
 0x123   : > { %2198 = vmatpush.bf16.msrb.mxu0 %v2957_v33  ;;  %2211 = vmatpush.bf16.msrb.mxu1 %v3085_v36 }
 0x124   : > { %2224 = vmatpush.bf16.msrb.mxu2 %v3213_v39 }
 0x125   : > { %2237 = vmatpush.bf16.msrb.mxu3 %v3341_v47 }
 0x127   : > { %2199 = vmatpush.bf16.msrb.mxu0 %v2941_v54  ;;  %2212 = vmatpush.bf16.msrb.mxu1 %v3069_v55 }
 0x128   : > { %2225 = vmatpush.bf16.msrb.mxu2 %v3197_v56  ;;  %v544_v56 = vperm.slane %v4513_v44, 3 }
 0x129   : > { %2238 = vmatpush.bf16.msrb.mxu3 %v3325_v60 }
 0x12b   : > { %2200 = vmatpush.bf16.msrb.mxu0 %v2925_v3  ;;  %2213 = vmatpush.bf16.msrb.mxu1 %v3053_v17  ;;  %v1994_v57 = vpop.f32.mrf.mxu0  ;;  %v2007_v12 = vpop.f32.mrf.mxu1 }
 0x12c   : > { %2226 = vmatpush.bf16.msrb.mxu2 %v3181_v5  ;;  %v1995_v11 = vadd.f32 %v1994_v57, %v1982_v4 }
 0x12d   : > { %2239 = vmatpush.bf16.msrb.mxu3 %v3309_v6 }
 0x12e   : > { %2201 = vmatmul.bf16.vlgmr.msrb.gmra.mxu0 %v4262_v37  ;;  %2214 = vmatmul.bf16.vlgmr.msrb.gmra.mxu1 %v4266_v40  ;;  %v2008_v13 = vadd.f32 %v2007_v12, %v1995_v11 }
 0x12f   : > { %2227 = vmatmul.bf16.vlgmr.msrb.gmra.mxu2 %v4258_v34 }
 0x130   : > { %2240 = vmatmul.bf16.vlgmr.msrb.gmra.mxu3 %v4264_v38 }
 0x133   : > { %v2033_v15 = vpop.f32.mrf.mxu3  ;;  %v1996_v19 = vpop.f32.mrf.mxu0 }
 0x134   : > { %v2020_v10 = vpop.f32.mrf.mxu2  ;;  %v2009_v20 = vpop.f32.mrf.mxu1 }
 0x135   : > { %v2021_v14 = vadd.f32 %v2020_v10, %v2008_v13 }
 0x137   : > { %v2034_v18 = vadd.f32 %v2033_v15, %v2021_v14 }
 0x139   : > { %2246 = vst [vmem:[%s4594_s28 + $0x8] sm:$0xff] %v2034_v18 }
 0x13b   : > { %v2035_v21 = vpop.f32.mrf.mxu3 }
 0x13c   : > { %v2022_v37 = vpop.f32.mrf.mxu2 }
 0x14b   : > { %v2046_v22 = vpop.f32.mrf.mxu0  ;;  %v2059_v40 = vpop.f32.mrf.mxu1 }
 0x14c   : > { %v2047_v28 = vadd.f32 %v2046_v22, %v543_v25 }
 0x14e   : > { %v2060_v29 = vadd.f32 %v2059_v40, %v2047_v28 }
 0x153   : > { %v2085_v34 = vpop.f32.mrf.mxu3  ;;  %v2048_v24 = vpop.f32.mrf.mxu0 }
 0x154   : > { %v2072_v23 = vpop.f32.mrf.mxu2  ;;  %v2061_v38 = vpop.f32.mrf.mxu1 }
 0x155   : > { %v2073_v30 = vadd.f32 %v2072_v23, %v2060_v29 }
 0x157   : > { %v2086_v31 = vadd.f32 %v2085_v34, %v2073_v30 }
 0x15b   : > { %v2087_v27 = vpop.f32.mrf.mxu3 }
 0x15c   : > { %v2074_v26 = vpop.f32.mrf.mxu2 }
 0x16b   : > { %v2098_v32 = vpop.f32.mrf.mxu0  ;;  %v2111_v35 = vpop.f32.mrf.mxu1 }
 0x16c   : > { %v2099_v33 = vadd.f32 %v2098_v32, %v2086_v31 }
 0x16e   : > { %v2112_v36 = vadd.f32 %v2111_v35, %v2099_v33 }
 0x173   : > { %v2137_v45 = vpop.f32.mrf.mxu3  ;;  %v2100_v41 = vpop.f32.mrf.mxu0 }
 0x174   : > { %v2124_v39 = vpop.f32.mrf.mxu2  ;;  %v2113_v47 = vpop.f32.mrf.mxu1 }
 0x175   : > { %v2125_v43 = vadd.f32 %v2124_v39, %v2112_v36 }
 0x177   : > { %v2138_v46 = vadd.f32 %v2137_v45, %v2125_v43 }
 0x179   : > { %2247 = vst [vmem:[%s4594_s28 + $0x10] sm:$0xff] %v2138_v46 }
 0x17b   : > { %v2139_v49 = vpop.f32.mrf.mxu3 }
 0x17c   : > { %v2126_v48 = vpop.f32.mrf.mxu2 }
 0x18b   : > { %v2150_v50 = vpop.f32.mrf.mxu0  ;;  %v2163_v51 = vpop.f32.mrf.mxu1 }
 0x18c   : > { %v2151_v63 = vadd.f32 %v2150_v50, %v544_v56 }
 0x18e   : > { %v2164_v59 = vadd.f32 %v2163_v51, %v2151_v63 }
 0x193   : > { %v2189_v53 = vpop.f32.mrf.mxu3  ;;  %v2152_v54 = vpop.f32.mrf.mxu0 }
 0x194   : > { %v2176_v52 = vpop.f32.mrf.mxu2  ;;  %v2165_v55 = vpop.f32.mrf.mxu1 }
 0x195   : > { %v2177_v60 = vadd.f32 %v2176_v52, %v2164_v59 }
 0x197   : > { %v2190_v61 = vadd.f32 %v2189_v53, %v2177_v60 }
 0x19b   : > { %v2191_v42 = vpop.f32.mrf.mxu3 }
 0x19c   : > { %v2178_v58 = vpop.f32.mrf.mxu2 }
 0x1ab   : > { %v2202_v16 = vpop.f32.mrf.mxu0  ;;  %v2215_v62 = vpop.f32.mrf.mxu1 }
 0x1ac   : > { %v2203_v0 = vadd.f32 %v2202_v16, %v2190_v61 }
 0x1ae   : > { %v2216_v9 = vadd.f32 %v2215_v62, %v2203_v0 }
 0x1b2   : > { %v2228_v1 = vpop.f32.mrf.mxu2 }
 0x1b3   : > { %v2229_v44 = vadd.f32 %v2228_v1, %v2216_v9  ;;  %v2241_v2 = vpop.f32.mrf.mxu3  ;;  %v2204_v3 = vpop.f32.mrf.mxu0 }
 0x1b4   : > { %v2217_v17 = vpop.f32.mrf.mxu1 }
 0x1b5   : > { %v2242_v5 = vadd.f32 %v2241_v2, %v2229_v44 }
 0x1b7   : > { %2248 = vst [vmem:[%s4594_s28 + $0x18] sm:$0xff] %v2242_v5 }
 0x1b8   : > { %3883 = shalt.err (!%p3880_p13)
}
 0x1b9   : > { %3693 = dma.vmem_to_hbm [thread:$0]  (%p4058_p0), %s2266_s10, 512, %s2268_s19, %s2250_s24  }
 0x1ba   : > { %v2230_v6 = vpop.f32.mrf.mxu2 }
 0x1bb   : > { %v2243_v7 = vpop.f32.mrf.mxu3 }
 0x1bc PF: > { %s2279_s29 = sand.u32 1, %s3922_s12   ;;  %p3707_p4 = pnand %p2387_p3, %p4062_p2 }
 0x1bd   : > { %s2280_s11 = scalar_lea.sflag [#allocation4], %s2279_s29 }
 0x1be   : > { %p3708_p5 = pneg %p3707_p4 }
 0x1c0   : > { %3917 = dma.done.wait (%p3708_p5), %s2280_s11, 512  }
 0x1c1   : > { %3919 = vsyncadd (%p3708_p5), %s2280_s11, 4294966784  ;;  %s20_s17 = sadd.s32 1, %s3942_s17   ;;  %s4743_s12 = smov %s3926_s13 }
 0x1c2   : > { %p17_p1 = scmp.ge.s32.totalorder %s20_s17, 4   ;;  %s4744_s13 = smov %s3930_s14 }
 0x1c3   : > { %s4745_s14 = smov %s4020_s25  ;;  %s4746_s15 = smov %s3938_s16 }
 0x1c4   : > { %s4747_s16 = smov %s4749_s18  ;;  %19 = sbr.rel (!%p17_p1) target bundleno = 7 (0x7), region = 94 }
 0x1c9   :  { %2286 = vsyncpa [#allocation3], 1 }
 0x1ca   :  { %2288 = vsyncpa [#allocation3 + $0x1], 1 }
 0x1cb   :  { %2289 = vsyncpa [#allocation6], 1 }
 0x1cc   :  { %2291 = vsyncpa [#allocation6 + $0x1], 1 }
 0x1cd   :  { %2292 = vsyncpa [#allocation4], 1 }
 0x1ce   :  { %2294 = vsyncpa [#allocation4 + $0x1], 1 }

</bundles_post_ra>
